<compile_context>
chip_gen: v5e
topology: v5e:2x2
jax: 0.10.0
libtpu: 0.0.40
codegen_flags: <defaults>
</compile_context>

<pallas_src>
import numpy as np
import jax
import jax.numpy as jnp
from jax.experimental import pallas as pl
from jax.experimental.pallas import tpu as pltpu

# ---------------- configuration (mirrors the example options in the module) ---------
MAX_CHARS = 50            # char_cnn.max_characters_per_token
N_CHARACTERS = 262        # char_cnn.n_characters
CHAR_EMBED_DIM = 4        # char_cnn.embedding.dim
FILTERS = [(1, 4), (2, 8), (3, 16), (4, 32), (5, 64)]   # char_cnn.filters
N_FILTERS = sum(n for _, n in FILTERS)                    # 124
N_HIGHWAY = 2             # char_cnn.n_highway
OUTPUT_DIM = 32           # lstm.projection_dim (small for this synthetic demo)

CONV_WMAX = max(w for w, _ in FILTERS)          # 5
IM2COL_K = CONV_WMAX * CHAR_EMBED_DIM           # 20 = packed conv contraction dim
HP = 128                                        # lane-padded hidden width (>= 124, >= OUTPUT_DIM)

BOS_CHAR, EOS_CHAR = 256, 257
BOW_CHAR, EOW_CHAR = 258, 259
PAD_CHAR = 260
TILE_N = 256                                    # tokens per grid step (sweepable 256/512/1024)

# static window indices for the im2col gather (glue)
WIN_IDX = np.arange(MAX_CHARS)[:, None] + np.arange(CONV_WMAX)[None, :]   # (50, 5), values 0..53


def _round_up(x, m):
    return ((x + m - 1) // m) * m


def _make_bos_eos(character):
    ids = np.full((MAX_CHARS,), PAD_CHAR, dtype=np.int32)
    ids[0] = BOW_CHAR
    ids[1] = character
    ids[2] = EOW_CHAR
    return ids + 1          # +1 offset, exactly as in the PyTorch module


BOS_CHARS = jnp.asarray(_make_bos_eos(BOS_CHAR))
EOS_CHARS = jnp.asarray(_make_bos_eos(EOS_CHAR))


# -------------------------- fused Pallas kernel -------------------------------------
def _elmo_fused_kernel(e_ref, mb_ref, wc_ref, *refs):
    """Fused char-CNN -> max/relu -> highway -> projection for one token tile.

    e_ref : (MAX_CHARS, tile_n, IM2COL_K)  position-major im2col char embeddings
    mb_ref: (MAX_CHARS, 1, HP)             per-position conv bias / -1e30 validity mask
    wc_ref: (IM2COL_K, HP)                 packed conv weights (all filters, zero-padded taps)
    refs  : [Wt, bt, Wg, bg] * N_HIGHWAY + [Wp, bp] + [out_ref]
    """
    out_ref = refs[-1]
    wc = wc_ref[...]                                     # hoisted: (20, 128)

    # --- char CNN: one packed matmul per position, running max over time ----------
    m = None
    for t in range(MAX_CHARS):                           # static unroll (50 positions)
        pt = jnp.dot(e_ref[t], wc, preferred_element_type=jnp.float32)   # (tile_n, 128)
        st = pt + mb_ref[t]                              # + bias, -1e30 on invalid positions
        m = st if m is None else jnp.maximum(m, st)
    x = jnp.maximum(m, 0.0)                              # relu(max over time), (tile_n, 128)

    # --- highway layers -------------------------------------------------------------
    idx = 0
    for _ in range(N_HIGHWAY):
        wt = refs[idx][...]; bt = refs[idx + 1][...]
        wg = refs[idx + 2][...]; bg = refs[idx + 3][...]
        idx += 4
        nonlinear = jnp.maximum(
            jnp.dot(x, wt, preferred_element_type=jnp.float32) + bt, 0.0)
        gate = jax.nn.sigmoid(
            jnp.dot(x, wg, preferred_element_type=jnp.float32) + bg)
        x = gate * x + (1.0 - gate) * nonlinear

    # --- projection (output padded to 128 lanes; real dims sliced in wrapper) --------
    wp = refs[idx][...]; bp = refs[idx + 1][...]
    out_ref[...] = jnp.dot(x, wp, preferred_element_type=jnp.float32) + bp


def _fused_forward(e_pm, mb, wc, weights, tile_n):
    n_pad = e_pm.shape[1]
    grid = (n_pad // tile_n,)
    in_specs = [
        pl.BlockSpec((MAX_CHARS, tile_n, IM2COL_K), lambda i: (0, i, 0)),   # activations
        pl.BlockSpec((MAX_CHARS, 1, HP), lambda i: (0, 0, 0)),              # bias/mask
        pl.BlockSpec((IM2COL_K, HP), lambda i: (0, 0)),                      # packed conv W
    ]
    for w in weights:   # highway + projection weights, constant block index (no re-fetch)
        in_specs.append(pl.BlockSpec(tuple(w.shape), lambda i, nd=w.ndim: (0,) * nd))
    return pl.pallas_call(
        _elmo_fused_kernel,
        grid=grid,
        in_specs=in_specs,
        out_specs=pl.BlockSpec((tile_n, HP), lambda i: (i, 0)),
        out_shape=jax.ShapeDtypeStruct((n_pad, HP), jnp.float32),
        compiler_params=pltpu.CompilerParams(dimension_semantics=("parallel",)),
    )(e_pm, mb, wc, *weights)


# ----------------------------- weight packing (glue) --------------------------------
def _pack_params(params):
    C = CHAR_EMBED_DIM
    w_blocks, bias_parts, width_parts = [], [], []
    for f, (w, num) in enumerate(FILTERS):
        Wf = params["conv_w"][f]                                              # (w, C, num)
        Wf = jnp.concatenate(
            [Wf, jnp.zeros((CONV_WMAX - w, C, num), jnp.float32)], axis=0)    # pad taps to 5
        w_blocks.append(Wf.reshape(CONV_WMAX * C, num))                       # (20, num)
        bias_parts.append(params["conv_b"][f].reshape(-1))
        width_parts.append(np.full((num,), w, np.int32))

    pad_cols = HP - N_FILTERS
    wc = jnp.concatenate(
        w_blocks + [jnp.zeros((IM2COL_K, pad_cols), jnp.float32)], axis=1)    # (20, 128)
    bias_row = jnp.concatenate(
        bias_parts + [jnp.zeros((pad_cols,), jnp.float32)])                   # (128,)
    widths = np.concatenate(width_parts + [np.ones((pad_cols,), np.int32)])   # (128,)
    # position t is valid for a width-w filter iff t + w - 1 <= 49
    valid = np.arange(MAX_CHARS)[:, None] <= (MAX_CHARS - widths)[None, :]    # (50, 128)
    mb = jnp.where(jnp.asarray(valid), bias_row[None, :], jnp.float32(-1e30)) # (50, 128)
    mb = mb[:, None, :]                                                        # (50, 1, 128)

    def pad_mat(W, r, c):
        return jnp.zeros((r, c), jnp.float32).at[: W.shape[0], : W.shape[1]].set(W)

    def pad_row(b, c):
        b = b.reshape(1, -1)
        return jnp.zeros((1, c), jnp.float32).at[:, : b.shape[1]].set(b)

    weights = []
    for l in range(N_HIGHWAY):
        weights += [pad_mat(params["hw_t"][l], HP, HP), pad_row(params["hb_t"][l], HP),
                    pad_mat(params["hw_g"][l], HP, HP), pad_row(params["hb_g"][l], HP)]
    weights += [pad_mat(params["proj_w"], HP, HP), pad_row(params["proj_b"], HP)]
    return mb, wc, weights


# ------------------------------------- forward --------------------------------------
def elmo_char_encoder_forward(inputs, params):
    """inputs: (B, S, 50) int32 char ids (already +1 offset, 0 = padding)."""
    b, s, _ = inputs.shape
    mask = (jnp.sum((inputs > 0).astype(jnp.int32), axis=-1) > 0).astype(jnp.int32)
    seq_lens = jnp.sum(mask, axis=1)

    # add_sentence_boundary_token_ids (3-D branch) -- glue
    ids = jnp.zeros((b, s + 2, MAX_CHARS), jnp.int32)
    ids = ids.at[:, 1:-1, :].set(inputs)
    ids = ids.at[:, 0, :].set(BOS_CHARS)
    ids = ids.at[jnp.arange(b), seq_lens + 1, :].set(EOS_CHARS)
    mask_with_bos_eos = (
        jnp.sum((ids > 0).astype(jnp.int32), axis=-1) > 0).astype(jnp.int32)

    n = b * (s + 2)
    flat_ids = ids.reshape(n, MAX_CHARS)

    # windowed (im2col) embedding gather -- glue.  Char padding id 0 maps to the all-zero
    # embedding row, so out-of-range taps contribute nothing to the packed conv matmul.
    ids_pad = jnp.pad(flat_ids, ((0, 0), (0, CONV_WMAX - 1)))          # (n, 54)
    win_ids = ids_pad[:, WIN_IDX]                                       # (n, 50, 5)

    tile_n = min(TILE_N, _round_up(n, 8))
    n_pad = _round_up(n, tile_n)
    win_ids = jnp.pad(win_ids, ((0, n_pad - n), (0, 0), (0, 0)))        # pad tokens with id 0
    win_ids_pm = jnp.transpose(win_ids, (1, 0, 2))                       # (50, n_pad, 5)
    e_pm = params["char_embedding"][win_ids_pm].reshape(
        MAX_CHARS, n_pad, IM2COL_K)                                      # (50, n_pad, 20) f32

    mb, wc, weights = _pack_params(params)
    tok = _fused_forward(e_pm, mb, wc, weights, tile_n)                  # (n_pad, 128)
    tok = tok[:n, :OUTPUT_DIM].reshape(b, s + 2, OUTPUT_DIM)
    return {"mask": mask_with_bos_eos, "token_embedding": tok}


# ---------------------------- pure-JAX reference (for checking) ---------------------
def _reference_core(e, params):
    convs = []
    for f, (width, num) in enumerate(FILTERS):
        W = params["conv_w"][f]
        bb = params["conv_b"][f]
        L = MAX_CHARS - width + 1
        s = jnp.zeros((e.shape[0], L, num), jnp.float32)
        for k in range(width):
            s = s + jnp.einsum("nlc,co->nlo", e[:, k:k + L, :], W[k])
        s = s + bb.reshape(1, 1, num)
        convs.append(jnp.maximum(jnp.max(s, axis=1), 0.0))
    x = jnp.concatenate(convs, axis=-1)
    for l in range(N_HIGHWAY):
        nl = jnp.maximum(x @ params["hw_t"][l] + params["hb_t"][l], 0.0)
        g = jax.nn.sigmoid(x @ params["hw_g"][l] + params["hb_g"][l])
        x = g * x + (1.0 - g) * nl
    return x @ params["proj_w"] + params["proj_b"]


# ---------------------------- deterministic parameter init --------------------------
def init_params(key):
    keys = jax.random.split(key, 32)
    p = {}
    emb = 0.1 * jax.random.normal(keys[0], (N_CHARACTERS + 1, CHAR_EMBED_DIM), jnp.float32)
    p["char_embedding"] = emb.at[0].set(0.0)      # row 0 is the padding row (all zeros)
    p["conv_w"], p["conv_b"] = [], []
    for i, (w, num) in enumerate(FILTERS):
        p["conv_w"].append(0.2 * jax.random.normal(keys[1 + i], (w, CHAR_EMBED_DIM, num), jnp.float32))
        p["conv_b"].append(0.1 * jax.random.normal(keys[6 + i], (1, num), jnp.float32))
    p["hw_t"], p["hb_t"], p["hw_g"], p["hb_g"] = [], [], [], []
    for l in range(N_HIGHWAY):
        p["hw_t"].append(0.05 * jax.random.normal(keys[11 + 4 * l], (N_FILTERS, N_FILTERS), jnp.float32))
        p["hb_t"].append(0.05 * jax.random.normal(keys[12 + 4 * l], (1, N_FILTERS), jnp.float32))
        p["hw_g"].append(0.05 * jax.random.normal(keys[13 + 4 * l], (N_FILTERS, N_FILTERS), jnp.float32))
        p["hb_g"].append(0.05 * jax.random.normal(keys[14 + 4 * l], (1, N_FILTERS), jnp.float32))
    p["proj_w"] = 0.05 * jax.random.normal(keys[20], (N_FILTERS, OUTPUT_DIM), jnp.float32)
    p["proj_b"] = 0.05 * jax.random.normal(keys[21], (1, OUTPUT_DIM), jnp.float32)
    return p


# --------------------------------------- main ---------------------------------------
if __name__ == "__main__":
    key = jax.random.PRNGKey(0)
    pkey, dkey = jax.random.split(key)
    params = init_params(pkey)

    # small synthetic batch: batch=2, seq_len=6, 50 chars per token
    B, S = 2, 6
    seq_lens = jnp.array([6, 4], dtype=jnp.int32)
    char_ids = jax.random.randint(dkey, (B, S, MAX_CHARS), 1, N_CHARACTERS, dtype=jnp.int32)
    token_valid = (jnp.arange(S)[None, :] < seq_lens[:, None]).astype(jnp.int32)
    char_ids = char_ids * token_valid[:, :, None]     # zero out padded tokens

    out = elmo_char_encoder_forward(char_ids, params)
    tok = jax.block_until_ready(out["token_embedding"])
    msk = jax.block_until_ready(out["mask"])

    # sanity check against a pure-JAX reference for the kernelized compute
    ids = jnp.zeros((B, S + 2, MAX_CHARS), jnp.int32)
    ids = ids.at[:, 1:-1, :].set(char_ids)
    ids = ids.at[:, 0, :].set(BOS_CHARS)
    ids = ids.at[jnp.arange(B), seq_lens + 1, :].set(EOS_CHARS)
    e_ref = params["char_embedding"][ids.reshape(-1, MAX_CHARS)]
    ref = _reference_core(e_ref, params).reshape(B, S + 2, OUTPUT_DIM)

    assert tok.shape == (B, S + 2, OUTPUT_DIM)
    assert msk.shape == (B, S + 2)
    np.testing.assert_allclose(np.asarray(tok), np.asarray(ref), rtol=1e-4, atol=1e-4)

    print("KERNEL_OK")
</pallas_src>

<mosaic_0001>
module attributes {stable_mosaic.version = 11 : i64} {
  func.func @_elmo_fused_kernel(%arg0: i32, %arg1: memref<50x16x20xf32, #tpu.memory_space<vmem>>, %arg2: memref<50x1x128xf32, #tpu.memory_space<vmem>>, %arg3: memref<20x128xf32, #tpu.memory_space<vmem>>, %arg4: memref<128x128xf32, #tpu.memory_space<vmem>>, %arg5: memref<1x128xf32, #tpu.memory_space<vmem>>, %arg6: memref<128x128xf32, #tpu.memory_space<vmem>>, %arg7: memref<1x128xf32, #tpu.memory_space<vmem>>, %arg8: memref<128x128xf32, #tpu.memory_space<vmem>>, %arg9: memref<1x128xf32, #tpu.memory_space<vmem>>, %arg10: memref<128x128xf32, #tpu.memory_space<vmem>>, %arg11: memref<1x128xf32, #tpu.memory_space<vmem>>, %arg12: memref<128x128xf32, #tpu.memory_space<vmem>>, %arg13: memref<1x128xf32, #tpu.memory_space<vmem>>, %arg14: memref<16x128xf32, #tpu.memory_space<vmem>>) attributes {dimension_semantics = [#tpu.dimension_semantics<parallel>], iteration_bounds = array<i64: 1>, scalar_prefetch = 0 : i64, scratch_operands = 0 : i64, tpu.core_type = #tpu.core_type<tc>, window_params = [{transform_indices = @transform_0, window_bounds = array<i64: 50, 16, 20>}, {pipeline_mode = #tpu.pipeline_mode<synchronous>, transform_indices = @transform_1, window_bounds = array<i64: 50, 1, 128>}, {pipeline_mode = #tpu.pipeline_mode<synchronous>, transform_indices = @transform_2, window_bounds = array<i64: 20, 128>}, {pipeline_mode = #tpu.pipeline_mode<synchronous>, transform_indices = @transform_3, window_bounds = array<i64: 128, 128>}, {pipeline_mode = #tpu.pipeline_mode<synchronous>, transform_indices = @transform_4, window_bounds = array<i64: 1, 128>}, {pipeline_mode = #tpu.pipeline_mode<synchronous>, transform_indices = @transform_5, window_bounds = array<i64: 128, 128>}, {pipeline_mode = #tpu.pipeline_mode<synchronous>, transform_indices = @transform_6, window_bounds = array<i64: 1, 128>}, {pipeline_mode = #tpu.pipeline_mode<synchronous>, transform_indices = @transform_7, window_bounds = array<i64: 128, 128>}, {pipeline_mode = #tpu.pipeline_mode<synchronous>, transform_indices = @transform_8, window_bounds = array<i64: 1, 128>}, {pipeline_mode = #tpu.pipeline_mode<synchronous>, transform_indices = @transform_9, window_bounds = array<i64: 128, 128>}, {pipeline_mode = #tpu.pipeline_mode<synchronous>, transform_indices = @transform_10, window_bounds = array<i64: 1, 128>}, {pipeline_mode = #tpu.pipeline_mode<synchronous>, transform_indices = @transform_11, window_bounds = array<i64: 128, 128>}, {pipeline_mode = #tpu.pipeline_mode<synchronous>, transform_indices = @transform_12, window_bounds = array<i64: 1, 128>}, {transform_indices = @transform_13, window_bounds = array<i64: 16, 128>}]} {
    %c0 = arith.constant 0 : index
    %c0_0 = arith.constant 0 : index
    %0 = vector.load %arg3[%c0, %c0_0] : memref<20x128xf32, #tpu.memory_space<vmem>>, vector<20x128xf32>
    %c0_1 = arith.constant 0 : index
    %c0_2 = arith.constant 0 : index
    %c0_3 = arith.constant 0 : index
    %1 = vector.load %arg1[%c0_1, %c0_2, %c0_3] : memref<50x16x20xf32, #tpu.memory_space<vmem>>, vector<1x16x20xf32>
    %2 = vector.shape_cast %1 : vector<1x16x20xf32> to vector<16x20xf32>
    %cst = arith.constant dense<0.000000e+00> : vector<16x128xf32>
    %3 = tpu.matmul %2, %0, %cst {dimension_numbers = #tpu.dot_dimension_numbers<[1], [0], [0], [1], [0, 0, 1, 1], [], []>} : vector<16x20xf32>, vector<20x128xf32>, vector<16x128xf32> -> vector<16x128xf32>
    %c0_4 = arith.constant 0 : index
    %c0_5 = arith.constant 0 : index
    %c0_6 = arith.constant 0 : index
    %4 = vector.load %arg2[%c0_4, %c0_5, %c0_6] : memref<50x1x128xf32, #tpu.memory_space<vmem>>, vector<1x1x128xf32>
    %5 = vector.shape_cast %4 : vector<1x1x128xf32> to vector<1x128xf32>
    %6 = vector.broadcast %5 : vector<1x128xf32> to vector<16x128xf32>
    %7 = arith.addf %3, %6 : vector<16x128xf32>
    %c1 = arith.constant 1 : index
    %c0_7 = arith.constant 0 : index
    %c0_8 = arith.constant 0 : index
    %8 = vector.load %arg1[%c1, %c0_7, %c0_8] : memref<50x16x20xf32, #tpu.memory_space<vmem>>, vector<1x16x20xf32>
    %9 = vector.shape_cast %8 : vector<1x16x20xf32> to vector<16x20xf32>
    %cst_9 = arith.constant dense<0.000000e+00> : vector<16x128xf32>
    %10 = tpu.matmul %9, %0, %cst_9 {dimension_numbers = #tpu.dot_dimension_numbers<[1], [0], [0], [1], [0, 0, 1, 1], [], []>} : vector<16x20xf32>, vector<20x128xf32>, vector<16x128xf32> -> vector<16x128xf32>
    %c1_10 = arith.constant 1 : index
    %c0_11 = arith.constant 0 : index
    %c0_12 = arith.constant 0 : index
    %11 = vector.load %arg2[%c1_10, %c0_11, %c0_12] : memref<50x1x128xf32, #tpu.memory_space<vmem>>, vector<1x1x128xf32>
    %12 = vector.shape_cast %11 : vector<1x1x128xf32> to vector<1x128xf32>
    %13 = vector.broadcast %12 : vector<1x128xf32> to vector<16x128xf32>
    %14 = arith.addf %10, %13 : vector<16x128xf32>
    %15 = arith.maximumf %7, %14 : vector<16x128xf32>
    %c2 = arith.constant 2 : index
    %c0_13 = arith.constant 0 : index
    %c0_14 = arith.constant 0 : index
    %16 = vector.load %arg1[%c2, %c0_13, %c0_14] : memref<50x16x20xf32, #tpu.memory_space<vmem>>, vector<1x16x20xf32>
    %17 = vector.shape_cast %16 : vector<1x16x20xf32> to vector<16x20xf32>
    %cst_15 = arith.constant dense<0.000000e+00> : vector<16x128xf32>
    %18 = tpu.matmul %17, %0, %cst_15 {dimension_numbers = #tpu.dot_dimension_numbers<[1], [0], [0], [1], [0, 0, 1, 1], [], []>} : vector<16x20xf32>, vector<20x128xf32>, vector<16x128xf32> -> vector<16x128xf32>
    %c2_16 = arith.constant 2 : index
    %c0_17 = arith.constant 0 : index
    %c0_18 = arith.constant 0 : index
    %19 = vector.load %arg2[%c2_16, %c0_17, %c0_18] : memref<50x1x128xf32, #tpu.memory_space<vmem>>, vector<1x1x128xf32>
    %20 = vector.shape_cast %19 : vector<1x1x128xf32> to vector<1x128xf32>
    %21 = vector.broadcast %20 : vector<1x128xf32> to vector<16x128xf32>
    %22 = arith.addf %18, %21 : vector<16x128xf32>
    %23 = arith.maximumf %15, %22 : vector<16x128xf32>
    %c3 = arith.constant 3 : index
    %c0_19 = arith.constant 0 : index
    %c0_20 = arith.constant 0 : index
    %24 = vector.load %arg1[%c3, %c0_19, %c0_20] : memref<50x16x20xf32, #tpu.memory_space<vmem>>, vector<1x16x20xf32>
    %25 = vector.shape_cast %24 : vector<1x16x20xf32> to vector<16x20xf32>
    %cst_21 = arith.constant dense<0.000000e+00> : vector<16x128xf32>
    %26 = tpu.matmul %25, %0, %cst_21 {dimension_numbers = #tpu.dot_dimension_numbers<[1], [0], [0], [1], [0, 0, 1, 1], [], []>} : vector<16x20xf32>, vector<20x128xf32>, vector<16x128xf32> -> vector<16x128xf32>
    %c3_22 = arith.constant 3 : index
    %c0_23 = arith.constant 0 : index
    %c0_24 = arith.constant 0 : index
    %27 = vector.load %arg2[%c3_22, %c0_23, %c0_24] : memref<50x1x128xf32, #tpu.memory_space<vmem>>, vector<1x1x128xf32>
    %28 = vector.shape_cast %27 : vector<1x1x128xf32> to vector<1x128xf32>
    %29 = vector.broadcast %28 : vector<1x128xf32> to vector<16x128xf32>
    %30 = arith.addf %26, %29 : vector<16x128xf32>
    %31 = arith.maximumf %23, %30 : vector<16x128xf32>
    %c4 = arith.constant 4 : index
    %c0_25 = arith.constant 0 : index
    %c0_26 = arith.constant 0 : index
    %32 = vector.load %arg1[%c4, %c0_25, %c0_26] : memref<50x16x20xf32, #tpu.memory_space<vmem>>, vector<1x16x20xf32>
    %33 = vector.shape_cast %32 : vector<1x16x20xf32> to vector<16x20xf32>
    %cst_27 = arith.constant dense<0.000000e+00> : vector<16x128xf32>
    %34 = tpu.matmul %33, %0, %cst_27 {dimension_numbers = #tpu.dot_dimension_numbers<[1], [0], [0], [1], [0, 0, 1, 1], [], []>} : vector<16x20xf32>, vector<20x128xf32>, vector<16x128xf32> -> vector<16x128xf32>
    %c4_28 = arith.constant 4 : index
    %c0_29 = arith.constant 0 : index
    %c0_30 = arith.constant 0 : index
    %35 = vector.load %arg2[%c4_28, %c0_29, %c0_30] : memref<50x1x128xf32, #tpu.memory_space<vmem>>, vector<1x1x128xf32>
    %36 = vector.shape_cast %35 : vector<1x1x128xf32> to vector<1x128xf32>
    %37 = vector.broadcast %36 : vector<1x128xf32> to vector<16x128xf32>
    %38 = arith.addf %34, %37 : vector<16x128xf32>
    %39 = arith.maximumf %31, %38 : vector<16x128xf32>
    %c5 = arith.constant 5 : index
    %c0_31 = arith.constant 0 : index
    %c0_32 = arith.constant 0 : index
    %40 = vector.load %arg1[%c5, %c0_31, %c0_32] : memref<50x16x20xf32, #tpu.memory_space<vmem>>, vector<1x16x20xf32>
    %41 = vector.shape_cast %40 : vector<1x16x20xf32> to vector<16x20xf32>
    %cst_33 = arith.constant dense<0.000000e+00> : vector<16x128xf32>
    %42 = tpu.matmul %41, %0, %cst_33 {dimension_numbers = #tpu.dot_dimension_numbers<[1], [0], [0], [1], [0, 0, 1, 1], [], []>} : vector<16x20xf32>, vector<20x128xf32>, vector<16x128xf32> -> vector<16x128xf32>
    %c5_34 = arith.constant 5 : index
    %c0_35 = arith.constant 0 : index
    %c0_36 = arith.constant 0 : index
    %43 = vector.load %arg2[%c5_34, %c0_35, %c0_36] : memref<50x1x128xf32, #tpu.memory_space<vmem>>, vector<1x1x128xf32>
    %44 = vector.shape_cast %43 : vector<1x1x128xf32> to vector<1x128xf32>
    %45 = vector.broadcast %44 : vector<1x128xf32> to vector<16x128xf32>
    %46 = arith.addf %42, %45 : vector<16x128xf32>
    %47 = arith.maximumf %39, %46 : vector<16x128xf32>
    %c6 = arith.constant 6 : index
    %c0_37 = arith.constant 0 : index
    %c0_38 = arith.constant 0 : index
    %48 = vector.load %arg1[%c6, %c0_37, %c0_38] : memref<50x16x20xf32, #tpu.memory_space<vmem>>, vector<1x16x20xf32>
    %49 = vector.shape_cast %48 : vector<1x16x20xf32> to vector<16x20xf32>
    %cst_39 = arith.constant dense<0.000000e+00> : vector<16x128xf32>
    %50 = tpu.matmul %49, %0, %cst_39 {dimension_numbers = #tpu.dot_dimension_numbers<[1], [0], [0], [1], [0, 0, 1, 1], [], []>} : vector<16x20xf32>, vector<20x128xf32>, vector<16x128xf32> -> vector<16x128xf32>
    %c6_40 = arith.constant 6 : index
    %c0_41 = arith.constant 0 : index
    %c0_42 = arith.constant 0 : index
    %51 = vector.load %arg2[%c6_40, %c0_41, %c0_42] : memref<50x1x128xf32, #tpu.memory_space<vmem>>, vector<1x1x128xf32>
    %52 = vector.shape_cast %51 : vector<1x1x128xf32> to vector<1x128xf32>
    %53 = vector.broadcast %52 : vector<1x128xf32> to vector<16x128xf32>
    %54 = arith.addf %50, %53 : vector<16x128xf32>
    %55 = arith.maximumf %47, %54 : vector<16x128xf32>
    %c7 = arith.constant 7 : index
    %c0_43 = arith.constant 0 : index
    %c0_44 = arith.constant 0 : index
    %56 = vector.load %arg1[%c7, %c0_43, %c0_44] : memref<50x16x20xf32, #tpu.memory_space<vmem>>, vector<1x16x20xf32>
    %57 = vector.shape_cast %56 : vector<1x16x20xf32> to vector<16x20xf32>
    %cst_45 = arith.constant dense<0.000000e+00> : vector<16x128xf32>
    %58 = tpu.matmul %57, %0, %cst_45 {dimension_numbers = #tpu.dot_dimension_numbers<[1], [0], [0], [1], [0, 0, 1, 1], [], []>} : vector<16x20xf32>, vector<20x128xf32>, vector<16x128xf32> -> vector<16x128xf32>
    %c7_46 = arith.constant 7 : index
    %c0_47 = arith.constant 0 : index
    %c0_48 = arith.constant 0 : index
    %59 = vector.load %arg2[%c7_46, %c0_47, %c0_48] : memref<50x1x128xf32, #tpu.memory_space<vmem>>, vector<1x1x128xf32>
    %60 = vector.shape_cast %59 : vector<1x1x128xf32> to vector<1x128xf32>
    %61 = vector.broadcast %60 : vector<1x128xf32> to vector<16x128xf32>
    %62 = arith.addf %58, %61 : vector<16x128xf32>
    %63 = arith.maximumf %55, %62 : vector<16x128xf32>
    %c8 = arith.constant 8 : index
    %c0_49 = arith.constant 0 : index
    %c0_50 = arith.constant 0 : index
    %64 = vector.load %arg1[%c8, %c0_49, %c0_50] : memref<50x16x20xf32, #tpu.memory_space<vmem>>, vector<1x16x20xf32>
    %65 = vector.shape_cast %64 : vector<1x16x20xf32> to vector<16x20xf32>
    %cst_51 = arith.constant dense<0.000000e+00> : vector<16x128xf32>
    %66 = tpu.matmul %65, %0, %cst_51 {dimension_numbers = #tpu.dot_dimension_numbers<[1], [0], [0], [1], [0, 0, 1, 1], [], []>} : vector<16x20xf32>, vector<20x128xf32>, vector<16x128xf32> -> vector<16x128xf32>
    %c8_52 = arith.constant 8 : index
    %c0_53 = arith.constant 0 : index
    %c0_54 = arith.constant 0 : index
    %67 = vector.load %arg2[%c8_52, %c0_53, %c0_54] : memref<50x1x128xf32, #tpu.memory_space<vmem>>, vector<1x1x128xf32>
    %68 = vector.shape_cast %67 : vector<1x1x128xf32> to vector<1x128xf32>
    %69 = vector.broadcast %68 : vector<1x128xf32> to vector<16x128xf32>
    %70 = arith.addf %66, %69 : vector<16x128xf32>
    %71 = arith.maximumf %63, %70 : vector<16x128xf32>
    %c9 = arith.constant 9 : index
    %c0_55 = arith.constant 0 : index
    %c0_56 = arith.constant 0 : index
    %72 = vector.load %arg1[%c9, %c0_55, %c0_56] : memref<50x16x20xf32, #tpu.memory_space<vmem>>, vector<1x16x20xf32>
    %73 = vector.shape_cast %72 : vector<1x16x20xf32> to vector<16x20xf32>
    %cst_57 = arith.constant dense<0.000000e+00> : vector<16x128xf32>
    %74 = tpu.matmul %73, %0, %cst_57 {dimension_numbers = #tpu.dot_dimension_numbers<[1], [0], [0], [1], [0, 0, 1, 1], [], []>} : vector<16x20xf32>, vector<20x128xf32>, vector<16x128xf32> -> vector<16x128xf32>
    %c9_58 = arith.constant 9 : index
    %c0_59 = arith.constant 0 : index
    %c0_60 = arith.constant 0 : index
    %75 = vector.load %arg2[%c9_58, %c0_59, %c0_60] : memref<50x1x128xf32, #tpu.memory_space<vmem>>, vector<1x1x128xf32>
    %76 = vector.shape_cast %75 : vector<1x1x128xf32> to vector<1x128xf32>
    %77 = vector.broadcast %76 : vector<1x128xf32> to vector<16x128xf32>
    %78 = arith.addf %74, %77 : vector<16x128xf32>
    %79 = arith.maximumf %71, %78 : vector<16x128xf32>
    %c10 = arith.constant 10 : index
    %c0_61 = arith.constant 0 : index
    %c0_62 = arith.constant 0 : index
    %80 = vector.load %arg1[%c10, %c0_61, %c0_62] : memref<50x16x20xf32, #tpu.memory_space<vmem>>, vector<1x16x20xf32>
    %81 = vector.shape_cast %80 : vector<1x16x20xf32> to vector<16x20xf32>
    %cst_63 = arith.constant dense<0.000000e+00> : vector<16x128xf32>
    %82 = tpu.matmul %81, %0, %cst_63 {dimension_numbers = #tpu.dot_dimension_numbers<[1], [0], [0], [1], [0, 0, 1, 1], [], []>} : vector<16x20xf32>, vector<20x128xf32>, vector<16x128xf32> -> vector<16x128xf32>
    %c10_64 = arith.constant 10 : index
    %c0_65 = arith.constant 0 : index
    %c0_66 = arith.constant 0 : index
    %83 = vector.load %arg2[%c10_64, %c0_65, %c0_66] : memref<50x1x128xf32, #tpu.memory_space<vmem>>, vector<1x1x128xf32>
    %84 = vector.shape_cast %83 : vector<1x1x128xf32> to vector<1x128xf32>
    %85 = vector.broadcast %84 : vector<1x128xf32> to vector<16x128xf32>
    %86 = arith.addf %82, %85 : vector<16x128xf32>
    %87 = arith.maximumf %79, %86 : vector<16x128xf32>
    %c11 = arith.constant 11 : index
    %c0_67 = arith.constant 0 : index
    %c0_68 = arith.constant 0 : index
    %88 = vector.load %arg1[%c11, %c0_67, %c0_68] : memref<50x16x20xf32, #tpu.memory_space<vmem>>, vector<1x16x20xf32>
    %89 = vector.shape_cast %88 : vector<1x16x20xf32> to vector<16x20xf32>
    %cst_69 = arith.constant dense<0.000000e+00> : vector<16x128xf32>
    %90 = tpu.matmul %89, %0, %cst_69 {dimension_numbers = #tpu.dot_dimension_numbers<[1], [0], [0], [1], [0, 0, 1, 1], [], []>} : vector<16x20xf32>, vector<20x128xf32>, vector<16x128xf32> -> vector<16x128xf32>
    %c11_70 = arith.constant 11 : index
    %c0_71 = arith.constant 0 : index
    %c0_72 = arith.constant 0 : index
    %91 = vector.load %arg2[%c11_70, %c0_71, %c0_72] : memref<50x1x128xf32, #tpu.memory_space<vmem>>, vector<1x1x128xf32>
    %92 = vector.shape_cast %91 : vector<1x1x128xf32> to vector<1x128xf32>
    %93 = vector.broadcast %92 : vector<1x128xf32> to vector<16x128xf32>
    %94 = arith.addf %90, %93 : vector<16x128xf32>
    %95 = arith.maximumf %87, %94 : vector<16x128xf32>
    %c12 = arith.constant 12 : index
    %c0_73 = arith.constant 0 : index
    %c0_74 = arith.constant 0 : index
    %96 = vector.load %arg1[%c12, %c0_73, %c0_74] : memref<50x16x20xf32, #tpu.memory_space<vmem>>, vector<1x16x20xf32>
    %97 = vector.shape_cast %96 : vector<1x16x20xf32> to vector<16x20xf32>
    %cst_75 = arith.constant dense<0.000000e+00> : vector<16x128xf32>
    %98 = tpu.matmul %97, %0, %cst_75 {dimension_numbers = #tpu.dot_dimension_numbers<[1], [0], [0], [1], [0, 0, 1, 1], [], []>} : vector<16x20xf32>, vector<20x128xf32>, vector<16x128xf32> -> vector<16x128xf32>
    %c12_76 = arith.constant 12 : index
    %c0_77 = arith.constant 0 : index
    %c0_78 = arith.constant 0 : index
    %99 = vector.load %arg2[%c12_76, %c0_77, %c0_78] : memref<50x1x128xf32, #tpu.memory_space<vmem>>, vector<1x1x128xf32>
    %100 = vector.shape_cast %99 : vector<1x1x128xf32> to vector<1x128xf32>
    %101 = vector.broadcast %100 : vector<1x128xf32> to vector<16x128xf32>
    %102 = arith.addf %98, %101 : vector<16x128xf32>
    %103 = arith.maximumf %95, %102 : vector<16x128xf32>
    %c13 = arith.constant 13 : index
    %c0_79 = arith.constant 0 : index
    %c0_80 = arith.constant 0 : index
    %104 = vector.load %arg1[%c13, %c0_79, %c0_80] : memref<50x16x20xf32, #tpu.memory_space<vmem>>, vector<1x16x20xf32>
    %105 = vector.shape_cast %104 : vector<1x16x20xf32> to vector<16x20xf32>
    %cst_81 = arith.constant dense<0.000000e+00> : vector<16x128xf32>
    %106 = tpu.matmul %105, %0, %cst_81 {dimension_numbers = #tpu.dot_dimension_numbers<[1], [0], [0], [1], [0, 0, 1, 1], [], []>} : vector<16x20xf32>, vector<20x128xf32>, vector<16x128xf32> -> vector<16x128xf32>
    %c13_82 = arith.constant 13 : index
    %c0_83 = arith.constant 0 : index
    %c0_84 = arith.constant 0 : index
    %107 = vector.load %arg2[%c13_82, %c0_83, %c0_84] : memref<50x1x128xf32, #tpu.memory_space<vmem>>, vector<1x1x128xf32>
    %108 = vector.shape_cast %107 : vector<1x1x128xf32> to vector<1x128xf32>
    %109 = vector.broadcast %108 : vector<1x128xf32> to vector<16x128xf32>
    %110 = arith.addf %106, %109 : vector<16x128xf32>
    %111 = arith.maximumf %103, %110 : vector<16x128xf32>
    %c14 = arith.constant 14 : index
    %c0_85 = arith.constant 0 : index
    %c0_86 = arith.constant 0 : index
    %112 = vector.load %arg1[%c14, %c0_85, %c0_86] : memref<50x16x20xf32, #tpu.memory_space<vmem>>, vector<1x16x20xf32>
    %113 = vector.shape_cast %112 : vector<1x16x20xf32> to vector<16x20xf32>
    %cst_87 = arith.constant dense<0.000000e+00> : vector<16x128xf32>
    %114 = tpu.matmul %113, %0, %cst_87 {dimension_numbers = #tpu.dot_dimension_numbers<[1], [0], [0], [1], [0, 0, 1, 1], [], []>} : vector<16x20xf32>, vector<20x128xf32>, vector<16x128xf32> -> vector<16x128xf32>
    %c14_88 = arith.constant 14 : index
    %c0_89 = arith.constant 0 : index
    %c0_90 = arith.constant 0 : index
    %115 = vector.load %arg2[%c14_88, %c0_89, %c0_90] : memref<50x1x128xf32, #tpu.memory_space<vmem>>, vector<1x1x128xf32>
    %116 = vector.shape_cast %115 : vector<1x1x128xf32> to vector<1x128xf32>
    %117 = vector.broadcast %116 : vector<1x128xf32> to vector<16x128xf32>
    %118 = arith.addf %114, %117 : vector<16x128xf32>
    %119 = arith.maximumf %111, %118 : vector<16x128xf32>
    %c15 = arith.constant 15 : index
    %c0_91 = arith.constant 0 : index
    %c0_92 = arith.constant 0 : index
    %120 = vector.load %arg1[%c15, %c0_91, %c0_92] : memref<50x16x20xf32, #tpu.memory_space<vmem>>, vector<1x16x20xf32>
    %121 = vector.shape_cast %120 : vector<1x16x20xf32> to vector<16x20xf32>
    %cst_93 = arith.constant dense<0.000000e+00> : vector<16x128xf32>
    %122 = tpu.matmul %121, %0, %cst_93 {dimension_numbers = #tpu.dot_dimension_numbers<[1], [0], [0], [1], [0, 0, 1, 1], [], []>} : vector<16x20xf32>, vector<20x128xf32>, vector<16x128xf32> -> vector<16x128xf32>
    %c15_94 = arith.constant 15 : index
    %c0_95 = arith.constant 0 : index
    %c0_96 = arith.constant 0 : index
    %123 = vector.load %arg2[%c15_94, %c0_95, %c0_96] : memref<50x1x128xf32, #tpu.memory_space<vmem>>, vector<1x1x128xf32>
    %124 = vector.shape_cast %123 : vector<1x1x128xf32> to vector<1x128xf32>
    %125 = vector.broadcast %124 : vector<1x128xf32> to vector<16x128xf32>
    %126 = arith.addf %122, %125 : vector<16x128xf32>
    %127 = arith.maximumf %119, %126 : vector<16x128xf32>
    %c16 = arith.constant 16 : index
    %c0_97 = arith.constant 0 : index
    %c0_98 = arith.constant 0 : index
    %128 = vector.load %arg1[%c16, %c0_97, %c0_98] : memref<50x16x20xf32, #tpu.memory_space<vmem>>, vector<1x16x20xf32>
    %129 = vector.shape_cast %128 : vector<1x16x20xf32> to vector<16x20xf32>
    %cst_99 = arith.constant dense<0.000000e+00> : vector<16x128xf32>
    %130 = tpu.matmul %129, %0, %cst_99 {dimension_numbers = #tpu.dot_dimension_numbers<[1], [0], [0], [1], [0, 0, 1, 1], [], []>} : vector<16x20xf32>, vector<20x128xf32>, vector<16x128xf32> -> vector<16x128xf32>
    %c16_100 = arith.constant 16 : index
    %c0_101 = arith.constant 0 : index
    %c0_102 = arith.constant 0 : index
    %131 = vector.load %arg2[%c16_100, %c0_101, %c0_102] : memref<50x1x128xf32, #tpu.memory_space<vmem>>, vector<1x1x128xf32>
    %132 = vector.shape_cast %131 : vector<1x1x128xf32> to vector<1x128xf32>
    %133 = vector.broadcast %132 : vector<1x128xf32> to vector<16x128xf32>
    %134 = arith.addf %130, %133 : vector<16x128xf32>
    %135 = arith.maximumf %127, %134 : vector<16x128xf32>
    %c17 = arith.constant 17 : index
    %c0_103 = arith.constant 0 : index
    %c0_104 = arith.constant 0 : index
    %136 = vector.load %arg1[%c17, %c0_103, %c0_104] : memref<50x16x20xf32, #tpu.memory_space<vmem>>, vector<1x16x20xf32>
    %137 = vector.shape_cast %136 : vector<1x16x20xf32> to vector<16x20xf32>
    %cst_105 = arith.constant dense<0.000000e+00> : vector<16x128xf32>
    %138 = tpu.matmul %137, %0, %cst_105 {dimension_numbers = #tpu.dot_dimension_numbers<[1], [0], [0], [1], [0, 0, 1, 1], [], []>} : vector<16x20xf32>, vector<20x128xf32>, vector<16x128xf32> -> vector<16x128xf32>
    %c17_106 = arith.constant 17 : index
    %c0_107 = arith.constant 0 : index
    %c0_108 = arith.constant 0 : index
    %139 = vector.load %arg2[%c17_106, %c0_107, %c0_108] : memref<50x1x128xf32, #tpu.memory_space<vmem>>, vector<1x1x128xf32>
    %140 = vector.shape_cast %139 : vector<1x1x128xf32> to vector<1x128xf32>
    %141 = vector.broadcast %140 : vector<1x128xf32> to vector<16x128xf32>
    %142 = arith.addf %138, %141 : vector<16x128xf32>
    %143 = arith.maximumf %135, %142 : vector<16x128xf32>
    %c18 = arith.constant 18 : index
    %c0_109 = arith.constant 0 : index
    %c0_110 = arith.constant 0 : index
    %144 = vector.load %arg1[%c18, %c0_109, %c0_110] : memref<50x16x20xf32, #tpu.memory_space<vmem>>, vector<1x16x20xf32>
    %145 = vector.shape_cast %144 : vector<1x16x20xf32> to vector<16x20xf32>
    %cst_111 = arith.constant dense<0.000000e+00> : vector<16x128xf32>
    %146 = tpu.matmul %145, %0, %cst_111 {dimension_numbers = #tpu.dot_dimension_numbers<[1], [0], [0], [1], [0, 0, 1, 1], [], []>} : vector<16x20xf32>, vector<20x128xf32>, vector<16x128xf32> -> vector<16x128xf32>
    %c18_112 = arith.constant 18 : index
    %c0_113 = arith.constant 0 : index
    %c0_114 = arith.constant 0 : index
    %147 = vector.load %arg2[%c18_112, %c0_113, %c0_114] : memref<50x1x128xf32, #tpu.memory_space<vmem>>, vector<1x1x128xf32>
    %148 = vector.shape_cast %147 : vector<1x1x128xf32> to vector<1x128xf32>
    %149 = vector.broadcast %148 : vector<1x128xf32> to vector<16x128xf32>
    %150 = arith.addf %146, %149 : vector<16x128xf32>
    %151 = arith.maximumf %143, %150 : vector<16x128xf32>
    %c19 = arith.constant 19 : index
    %c0_115 = arith.constant 0 : index
    %c0_116 = arith.constant 0 : index
    %152 = vector.load %arg1[%c19, %c0_115, %c0_116] : memref<50x16x20xf32, #tpu.memory_space<vmem>>, vector<1x16x20xf32>
    %153 = vector.shape_cast %152 : vector<1x16x20xf32> to vector<16x20xf32>
    %cst_117 = arith.constant dense<0.000000e+00> : vector<16x128xf32>
    %154 = tpu.matmul %153, %0, %cst_117 {dimension_numbers = #tpu.dot_dimension_numbers<[1], [0], [0], [1], [0, 0, 1, 1], [], []>} : vector<16x20xf32>, vector<20x128xf32>, vector<16x128xf32> -> vector<16x128xf32>
    %c19_118 = arith.constant 19 : index
    %c0_119 = arith.constant 0 : index
    %c0_120 = arith.constant 0 : index
    %155 = vector.load %arg2[%c19_118, %c0_119, %c0_120] : memref<50x1x128xf32, #tpu.memory_space<vmem>>, vector<1x1x128xf32>
    %156 = vector.shape_cast %155 : vector<1x1x128xf32> to vector<1x128xf32>
    %157 = vector.broadcast %156 : vector<1x128xf32> to vector<16x128xf32>
    %158 = arith.addf %154, %157 : vector<16x128xf32>
    %159 = arith.maximumf %151, %158 : vector<16x128xf32>
    %c20 = arith.constant 20 : index
    %c0_121 = arith.constant 0 : index
    %c0_122 = arith.constant 0 : index
    %160 = vector.load %arg1[%c20, %c0_121, %c0_122] : memref<50x16x20xf32, #tpu.memory_space<vmem>>, vector<1x16x20xf32>
    %161 = vector.shape_cast %160 : vector<1x16x20xf32> to vector<16x20xf32>
    %cst_123 = arith.constant dense<0.000000e+00> : vector<16x128xf32>
    %162 = tpu.matmul %161, %0, %cst_123 {dimension_numbers = #tpu.dot_dimension_numbers<[1], [0], [0], [1], [0, 0, 1, 1], [], []>} : vector<16x20xf32>, vector<20x128xf32>, vector<16x128xf32> -> vector<16x128xf32>
    %c20_124 = arith.constant 20 : index
    %c0_125 = arith.constant 0 : index
    %c0_126 = arith.constant 0 : index
    %163 = vector.load %arg2[%c20_124, %c0_125, %c0_126] : memref<50x1x128xf32, #tpu.memory_space<vmem>>, vector<1x1x128xf32>
    %164 = vector.shape_cast %163 : vector<1x1x128xf32> to vector<1x128xf32>
    %165 = vector.broadcast %164 : vector<1x128xf32> to vector<16x128xf32>
    %166 = arith.addf %162, %165 : vector<16x128xf32>
    %167 = arith.maximumf %159, %166 : vector<16x128xf32>
    %c21 = arith.constant 21 : index
    %c0_127 = arith.constant 0 : index
    %c0_128 = arith.constant 0 : index
    %168 = vector.load %arg1[%c21, %c0_127, %c0_128] : memref<50x16x20xf32, #tpu.memory_space<vmem>>, vector<1x16x20xf32>
    %169 = vector.shape_cast %168 : vector<1x16x20xf32> to vector<16x20xf32>
    %cst_129 = arith.constant dense<0.000000e+00> : vector<16x128xf32>
    %170 = tpu.matmul %169, %0, %cst_129 {dimension_numbers = #tpu.dot_dimension_numbers<[1], [0], [0], [1], [0, 0, 1, 1], [], []>} : vector<16x20xf32>, vector<20x128xf32>, vector<16x128xf32> -> vector<16x128xf32>
    %c21_130 = arith.constant 21 : index
    %c0_131 = arith.constant 0 : index
    %c0_132 = arith.constant 0 : index
    %171 = vector.load %arg2[%c21_130, %c0_131, %c0_132] : memref<50x1x128xf32, #tpu.memory_space<vmem>>, vector<1x1x128xf32>
    %172 = vector.shape_cast %171 : vector<1x1x128xf32> to vector<1x128xf32>
    %173 = vector.broadcast %172 : vector<1x128xf32> to vector<16x128xf32>
    %174 = arith.addf %170, %173 : vector<16x128xf32>
    %175 = arith.maximumf %167, %174 : vector<16x128xf32>
    %c22 = arith.constant 22 : index
    %c0_133 = arith.constant 0 : index
    %c0_134 = arith.constant 0 : index
    %176 = vector.load %arg1[%c22, %c0_133, %c0_134] : memref<50x16x20xf32, #tpu.memory_space<vmem>>, vector<1x16x20xf32>
    %177 = vector.shape_cast %176 : vector<1x16x20xf32> to vector<16x20xf32>
    %cst_135 = arith.constant dense<0.000000e+00> : vector<16x128xf32>
    %178 = tpu.matmul %177, %0, %cst_135 {dimension_numbers = #tpu.dot_dimension_numbers<[1], [0], [0], [1], [0, 0, 1, 1], [], []>} : vector<16x20xf32>, vector<20x128xf32>, vector<16x128xf32> -> vector<16x128xf32>
    %c22_136 = arith.constant 22 : index
    %c0_137 = arith.constant 0 : index
    %c0_138 = arith.constant 0 : index
    %179 = vector.load %arg2[%c22_136, %c0_137, %c0_138] : memref<50x1x128xf32, #tpu.memory_space<vmem>>, vector<1x1x128xf32>
    %180 = vector.shape_cast %179 : vector<1x1x128xf32> to vector<1x128xf32>
    %181 = vector.broadcast %180 : vector<1x128xf32> to vector<16x128xf32>
    %182 = arith.addf %178, %181 : vector<16x128xf32>
    %183 = arith.maximumf %175, %182 : vector<16x128xf32>
    %c23 = arith.constant 23 : index
    %c0_139 = arith.constant 0 : index
    %c0_140 = arith.constant 0 : index
    %184 = vector.load %arg1[%c23, %c0_139, %c0_140] : memref<50x16x20xf32, #tpu.memory_space<vmem>>, vector<1x16x20xf32>
    %185 = vector.shape_cast %184 : vector<1x16x20xf32> to vector<16x20xf32>
    %cst_141 = arith.constant dense<0.000000e+00> : vector<16x128xf32>
    %186 = tpu.matmul %185, %0, %cst_141 {dimension_numbers = #tpu.dot_dimension_numbers<[1], [0], [0], [1], [0, 0, 1, 1], [], []>} : vector<16x20xf32>, vector<20x128xf32>, vector<16x128xf32> -> vector<16x128xf32>
    %c23_142 = arith.constant 23 : index
    %c0_143 = arith.constant 0 : index
    %c0_144 = arith.constant 0 : index
    %187 = vector.load %arg2[%c23_142, %c0_143, %c0_144] : memref<50x1x128xf32, #tpu.memory_space<vmem>>, vector<1x1x128xf32>
    %188 = vector.shape_cast %187 : vector<1x1x128xf32> to vector<1x128xf32>
    %189 = vector.broadcast %188 : vector<1x128xf32> to vector<16x128xf32>
    %190 = arith.addf %186, %189 : vector<16x128xf32>
    %191 = arith.maximumf %183, %190 : vector<16x128xf32>
    %c24 = arith.constant 24 : index
    %c0_145 = arith.constant 0 : index
    %c0_146 = arith.constant 0 : index
    %192 = vector.load %arg1[%c24, %c0_145, %c0_146] : memref<50x16x20xf32, #tpu.memory_space<vmem>>, vector<1x16x20xf32>
    %193 = vector.shape_cast %192 : vector<1x16x20xf32> to vector<16x20xf32>
    %cst_147 = arith.constant dense<0.000000e+00> : vector<16x128xf32>
    %194 = tpu.matmul %193, %0, %cst_147 {dimension_numbers = #tpu.dot_dimension_numbers<[1], [0], [0], [1], [0, 0, 1, 1], [], []>} : vector<16x20xf32>, vector<20x128xf32>, vector<16x128xf32> -> vector<16x128xf32>
    %c24_148 = arith.constant 24 : index
    %c0_149 = arith.constant 0 : index
    %c0_150 = arith.constant 0 : index
    %195 = vector.load %arg2[%c24_148, %c0_149, %c0_150] : memref<50x1x128xf32, #tpu.memory_space<vmem>>, vector<1x1x128xf32>
    %196 = vector.shape_cast %195 : vector<1x1x128xf32> to vector<1x128xf32>
    %197 = vector.broadcast %196 : vector<1x128xf32> to vector<16x128xf32>
    %198 = arith.addf %194, %197 : vector<16x128xf32>
    %199 = arith.maximumf %191, %198 : vector<16x128xf32>
    %c25 = arith.constant 25 : index
    %c0_151 = arith.constant 0 : index
    %c0_152 = arith.constant 0 : index
    %200 = vector.load %arg1[%c25, %c0_151, %c0_152] : memref<50x16x20xf32, #tpu.memory_space<vmem>>, vector<1x16x20xf32>
    %201 = vector.shape_cast %200 : vector<1x16x20xf32> to vector<16x20xf32>
    %cst_153 = arith.constant dense<0.000000e+00> : vector<16x128xf32>
    %202 = tpu.matmul %201, %0, %cst_153 {dimension_numbers = #tpu.dot_dimension_numbers<[1], [0], [0], [1], [0, 0, 1, 1], [], []>} : vector<16x20xf32>, vector<20x128xf32>, vector<16x128xf32> -> vector<16x128xf32>
    %c25_154 = arith.constant 25 : index
    %c0_155 = arith.constant 0 : index
    %c0_156 = arith.constant 0 : index
    %203 = vector.load %arg2[%c25_154, %c0_155, %c0_156] : memref<50x1x128xf32, #tpu.memory_space<vmem>>, vector<1x1x128xf32>
    %204 = vector.shape_cast %203 : vector<1x1x128xf32> to vector<1x128xf32>
    %205 = vector.broadcast %204 : vector<1x128xf32> to vector<16x128xf32>
    %206 = arith.addf %202, %205 : vector<16x128xf32>
    %207 = arith.maximumf %199, %206 : vector<16x128xf32>
    %c26 = arith.constant 26 : index
    %c0_157 = arith.constant 0 : index
    %c0_158 = arith.constant 0 : index
    %208 = vector.load %arg1[%c26, %c0_157, %c0_158] : memref<50x16x20xf32, #tpu.memory_space<vmem>>, vector<1x16x20xf32>
    %209 = vector.shape_cast %208 : vector<1x16x20xf32> to vector<16x20xf32>
    %cst_159 = arith.constant dense<0.000000e+00> : vector<16x128xf32>
    %210 = tpu.matmul %209, %0, %cst_159 {dimension_numbers = #tpu.dot_dimension_numbers<[1], [0], [0], [1], [0, 0, 1, 1], [], []>} : vector<16x20xf32>, vector<20x128xf32>, vector<16x128xf32> -> vector<16x128xf32>
    %c26_160 = arith.constant 26 : index
    %c0_161 = arith.constant 0 : index
    %c0_162 = arith.constant 0 : index
    %211 = vector.load %arg2[%c26_160, %c0_161, %c0_162] : memref<50x1x128xf32, #tpu.memory_space<vmem>>, vector<1x1x128xf32>
    %212 = vector.shape_cast %211 : vector<1x1x128xf32> to vector<1x128xf32>
    %213 = vector.broadcast %212 : vector<1x128xf32> to vector<16x128xf32>
    %214 = arith.addf %210, %213 : vector<16x128xf32>
    %215 = arith.maximumf %207, %214 : vector<16x128xf32>
    %c27 = arith.constant 27 : index
    %c0_163 = arith.constant 0 : index
    %c0_164 = arith.constant 0 : index
    %216 = vector.load %arg1[%c27, %c0_163, %c0_164] : memref<50x16x20xf32, #tpu.memory_space<vmem>>, vector<1x16x20xf32>
    %217 = vector.shape_cast %216 : vector<1x16x20xf32> to vector<16x20xf32>
    %cst_165 = arith.constant dense<0.000000e+00> : vector<16x128xf32>
    %218 = tpu.matmul %217, %0, %cst_165 {dimension_numbers = #tpu.dot_dimension_numbers<[1], [0], [0], [1], [0, 0, 1, 1], [], []>} : vector<16x20xf32>, vector<20x128xf32>, vector<16x128xf32> -> vector<16x128xf32>
    %c27_166 = arith.constant 27 : index
    %c0_167 = arith.constant 0 : index
    %c0_168 = arith.constant 0 : index
    %219 = vector.load %arg2[%c27_166, %c0_167, %c0_168] : memref<50x1x128xf32, #tpu.memory_space<vmem>>, vector<1x1x128xf32>
    %220 = vector.shape_cast %219 : vector<1x1x128xf32> to vector<1x128xf32>
    %221 = vector.broadcast %220 : vector<1x128xf32> to vector<16x128xf32>
    %222 = arith.addf %218, %221 : vector<16x128xf32>
    %223 = arith.maximumf %215, %222 : vector<16x128xf32>
    %c28 = arith.constant 28 : index
    %c0_169 = arith.constant 0 : index
    %c0_170 = arith.constant 0 : index
    %224 = vector.load %arg1[%c28, %c0_169, %c0_170] : memref<50x16x20xf32, #tpu.memory_space<vmem>>, vector<1x16x20xf32>
    %225 = vector.shape_cast %224 : vector<1x16x20xf32> to vector<16x20xf32>
    %cst_171 = arith.constant dense<0.000000e+00> : vector<16x128xf32>
    %226 = tpu.matmul %225, %0, %cst_171 {dimension_numbers = #tpu.dot_dimension_numbers<[1], [0], [0], [1], [0, 0, 1, 1], [], []>} : vector<16x20xf32>, vector<20x128xf32>, vector<16x128xf32> -> vector<16x128xf32>
    %c28_172 = arith.constant 28 : index
    %c0_173 = arith.constant 0 : index
    %c0_174 = arith.constant 0 : index
    %227 = vector.load %arg2[%c28_172, %c0_173, %c0_174] : memref<50x1x128xf32, #tpu.memory_space<vmem>>, vector<1x1x128xf32>
    %228 = vector.shape_cast %227 : vector<1x1x128xf32> to vector<1x128xf32>
    %229 = vector.broadcast %228 : vector<1x128xf32> to vector<16x128xf32>
    %230 = arith.addf %226, %229 : vector<16x128xf32>
    %231 = arith.maximumf %223, %230 : vector<16x128xf32>
    %c29 = arith.constant 29 : index
    %c0_175 = arith.constant 0 : index
    %c0_176 = arith.constant 0 : index
    %232 = vector.load %arg1[%c29, %c0_175, %c0_176] : memref<50x16x20xf32, #tpu.memory_space<vmem>>, vector<1x16x20xf32>
    %233 = vector.shape_cast %232 : vector<1x16x20xf32> to vector<16x20xf32>
    %cst_177 = arith.constant dense<0.000000e+00> : vector<16x128xf32>
    %234 = tpu.matmul %233, %0, %cst_177 {dimension_numbers = #tpu.dot_dimension_numbers<[1], [0], [0], [1], [0, 0, 1, 1], [], []>} : vector<16x20xf32>, vector<20x128xf32>, vector<16x128xf32> -> vector<16x128xf32>
    %c29_178 = arith.constant 29 : index
    %c0_179 = arith.constant 0 : index
    %c0_180 = arith.constant 0 : index
    %235 = vector.load %arg2[%c29_178, %c0_179, %c0_180] : memref<50x1x128xf32, #tpu.memory_space<vmem>>, vector<1x1x128xf32>
    %236 = vector.shape_cast %235 : vector<1x1x128xf32> to vector<1x128xf32>
    %237 = vector.broadcast %236 : vector<1x128xf32> to vector<16x128xf32>
    %238 = arith.addf %234, %237 : vector<16x128xf32>
    %239 = arith.maximumf %231, %238 : vector<16x128xf32>
    %c30 = arith.constant 30 : index
    %c0_181 = arith.constant 0 : index
    %c0_182 = arith.constant 0 : index
    %240 = vector.load %arg1[%c30, %c0_181, %c0_182] : memref<50x16x20xf32, #tpu.memory_space<vmem>>, vector<1x16x20xf32>
    %241 = vector.shape_cast %240 : vector<1x16x20xf32> to vector<16x20xf32>
    %cst_183 = arith.constant dense<0.000000e+00> : vector<16x128xf32>
    %242 = tpu.matmul %241, %0, %cst_183 {dimension_numbers = #tpu.dot_dimension_numbers<[1], [0], [0], [1], [0, 0, 1, 1], [], []>} : vector<16x20xf32>, vector<20x128xf32>, vector<16x128xf32> -> vector<16x128xf32>
    %c30_184 = arith.constant 30 : index
    %c0_185 = arith.constant 0 : index
    %c0_186 = arith.constant 0 : index
    %243 = vector.load %arg2[%c30_184, %c0_185, %c0_186] : memref<50x1x128xf32, #tpu.memory_space<vmem>>, vector<1x1x128xf32>
    %244 = vector.shape_cast %243 : vector<1x1x128xf32> to vector<1x128xf32>
    %245 = vector.broadcast %244 : vector<1x128xf32> to vector<16x128xf32>
    %246 = arith.addf %242, %245 : vector<16x128xf32>
    %247 = arith.maximumf %239, %246 : vector<16x128xf32>
    %c31 = arith.constant 31 : index
    %c0_187 = arith.constant 0 : index
    %c0_188 = arith.constant 0 : index
    %248 = vector.load %arg1[%c31, %c0_187, %c0_188] : memref<50x16x20xf32, #tpu.memory_space<vmem>>, vector<1x16x20xf32>
    %249 = vector.shape_cast %248 : vector<1x16x20xf32> to vector<16x20xf32>
    %cst_189 = arith.constant dense<0.000000e+00> : vector<16x128xf32>
    %250 = tpu.matmul %249, %0, %cst_189 {dimension_numbers = #tpu.dot_dimension_numbers<[1], [0], [0], [1], [0, 0, 1, 1], [], []>} : vector<16x20xf32>, vector<20x128xf32>, vector<16x128xf32> -> vector<16x128xf32>
    %c31_190 = arith.constant 31 : index
    %c0_191 = arith.constant 0 : index
    %c0_192 = arith.constant 0 : index
    %251 = vector.load %arg2[%c31_190, %c0_191, %c0_192] : memref<50x1x128xf32, #tpu.memory_space<vmem>>, vector<1x1x128xf32>
    %252 = vector.shape_cast %251 : vector<1x1x128xf32> to vector<1x128xf32>
    %253 = vector.broadcast %252 : vector<1x128xf32> to vector<16x128xf32>
    %254 = arith.addf %250, %253 : vector<16x128xf32>
    %255 = arith.maximumf %247, %254 : vector<16x128xf32>
    %c32 = arith.constant 32 : index
    %c0_193 = arith.constant 0 : index
    %c0_194 = arith.constant 0 : index
    %256 = vector.load %arg1[%c32, %c0_193, %c0_194] : memref<50x16x20xf32, #tpu.memory_space<vmem>>, vector<1x16x20xf32>
    %257 = vector.shape_cast %256 : vector<1x16x20xf32> to vector<16x20xf32>
    %cst_195 = arith.constant dense<0.000000e+00> : vector<16x128xf32>
    %258 = tpu.matmul %257, %0, %cst_195 {dimension_numbers = #tpu.dot_dimension_numbers<[1], [0], [0], [1], [0, 0, 1, 1], [], []>} : vector<16x20xf32>, vector<20x128xf32>, vector<16x128xf32> -> vector<16x128xf32>
    %c32_196 = arith.constant 32 : index
    %c0_197 = arith.constant 0 : index
    %c0_198 = arith.constant 0 : index
    %259 = vector.load %arg2[%c32_196, %c0_197, %c0_198] : memref<50x1x128xf32, #tpu.memory_space<vmem>>, vector<1x1x128xf32>
    %260 = vector.shape_cast %259 : vector<1x1x128xf32> to vector<1x128xf32>
    %261 = vector.broadcast %260 : vector<1x128xf32> to vector<16x128xf32>
    %262 = arith.addf %258, %261 : vector<16x128xf32>
    %263 = arith.maximumf %255, %262 : vector<16x128xf32>
    %c33 = arith.constant 33 : index
    %c0_199 = arith.constant 0 : index
    %c0_200 = arith.constant 0 : index
    %264 = vector.load %arg1[%c33, %c0_199, %c0_200] : memref<50x16x20xf32, #tpu.memory_space<vmem>>, vector<1x16x20xf32>
    %265 = vector.shape_cast %264 : vector<1x16x20xf32> to vector<16x20xf32>
    %cst_201 = arith.constant dense<0.000000e+00> : vector<16x128xf32>
    %266 = tpu.matmul %265, %0, %cst_201 {dimension_numbers = #tpu.dot_dimension_numbers<[1], [0], [0], [1], [0, 0, 1, 1], [], []>} : vector<16x20xf32>, vector<20x128xf32>, vector<16x128xf32> -> vector<16x128xf32>
    %c33_202 = arith.constant 33 : index
    %c0_203 = arith.constant 0 : index
    %c0_204 = arith.constant 0 : index
    %267 = vector.load %arg2[%c33_202, %c0_203, %c0_204] : memref<50x1x128xf32, #tpu.memory_space<vmem>>, vector<1x1x128xf32>
    %268 = vector.shape_cast %267 : vector<1x1x128xf32> to vector<1x128xf32>
    %269 = vector.broadcast %268 : vector<1x128xf32> to vector<16x128xf32>
    %270 = arith.addf %266, %269 : vector<16x128xf32>
    %271 = arith.maximumf %263, %270 : vector<16x128xf32>
    %c34 = arith.constant 34 : index
    %c0_205 = arith.constant 0 : index
    %c0_206 = arith.constant 0 : index
    %272 = vector.load %arg1[%c34, %c0_205, %c0_206] : memref<50x16x20xf32, #tpu.memory_space<vmem>>, vector<1x16x20xf32>
    %273 = vector.shape_cast %272 : vector<1x16x20xf32> to vector<16x20xf32>
    %cst_207 = arith.constant dense<0.000000e+00> : vector<16x128xf32>
    %274 = tpu.matmul %273, %0, %cst_207 {dimension_numbers = #tpu.dot_dimension_numbers<[1], [0], [0], [1], [0, 0, 1, 1], [], []>} : vector<16x20xf32>, vector<20x128xf32>, vector<16x128xf32> -> vector<16x128xf32>
    %c34_208 = arith.constant 34 : index
    %c0_209 = arith.constant 0 : index
    %c0_210 = arith.constant 0 : index
    %275 = vector.load %arg2[%c34_208, %c0_209, %c0_210] : memref<50x1x128xf32, #tpu.memory_space<vmem>>, vector<1x1x128xf32>
    %276 = vector.shape_cast %275 : vector<1x1x128xf32> to vector<1x128xf32>
    %277 = vector.broadcast %276 : vector<1x128xf32> to vector<16x128xf32>
    %278 = arith.addf %274, %277 : vector<16x128xf32>
    %279 = arith.maximumf %271, %278 : vector<16x128xf32>
    %c35 = arith.constant 35 : index
    %c0_211 = arith.constant 0 : index
    %c0_212 = arith.constant 0 : index
    %280 = vector.load %arg1[%c35, %c0_211, %c0_212] : memref<50x16x20xf32, #tpu.memory_space<vmem>>, vector<1x16x20xf32>
    %281 = vector.shape_cast %280 : vector<1x16x20xf32> to vector<16x20xf32>
    %cst_213 = arith.constant dense<0.000000e+00> : vector<16x128xf32>
    %282 = tpu.matmul %281, %0, %cst_213 {dimension_numbers = #tpu.dot_dimension_numbers<[1], [0], [0], [1], [0, 0, 1, 1], [], []>} : vector<16x20xf32>, vector<20x128xf32>, vector<16x128xf32> -> vector<16x128xf32>
    %c35_214 = arith.constant 35 : index
    %c0_215 = arith.constant 0 : index
    %c0_216 = arith.constant 0 : index
    %283 = vector.load %arg2[%c35_214, %c0_215, %c0_216] : memref<50x1x128xf32, #tpu.memory_space<vmem>>, vector<1x1x128xf32>
    %284 = vector.shape_cast %283 : vector<1x1x128xf32> to vector<1x128xf32>
    %285 = vector.broadcast %284 : vector<1x128xf32> to vector<16x128xf32>
    %286 = arith.addf %282, %285 : vector<16x128xf32>
    %287 = arith.maximumf %279, %286 : vector<16x128xf32>
    %c36 = arith.constant 36 : index
    %c0_217 = arith.constant 0 : index
    %c0_218 = arith.constant 0 : index
    %288 = vector.load %arg1[%c36, %c0_217, %c0_218] : memref<50x16x20xf32, #tpu.memory_space<vmem>>, vector<1x16x20xf32>
    %289 = vector.shape_cast %288 : vector<1x16x20xf32> to vector<16x20xf32>
    %cst_219 = arith.constant dense<0.000000e+00> : vector<16x128xf32>
    %290 = tpu.matmul %289, %0, %cst_219 {dimension_numbers = #tpu.dot_dimension_numbers<[1], [0], [0], [1], [0, 0, 1, 1], [], []>} : vector<16x20xf32>, vector<20x128xf32>, vector<16x128xf32> -> vector<16x128xf32>
    %c36_220 = arith.constant 36 : index
    %c0_221 = arith.constant 0 : index
    %c0_222 = arith.constant 0 : index
    %291 = vector.load %arg2[%c36_220, %c0_221, %c0_222] : memref<50x1x128xf32, #tpu.memory_space<vmem>>, vector<1x1x128xf32>
    %292 = vector.shape_cast %291 : vector<1x1x128xf32> to vector<1x128xf32>
    %293 = vector.broadcast %292 : vector<1x128xf32> to vector<16x128xf32>
    %294 = arith.addf %290, %293 : vector<16x128xf32>
    %295 = arith.maximumf %287, %294 : vector<16x128xf32>
    %c37 = arith.constant 37 : index
    %c0_223 = arith.constant 0 : index
    %c0_224 = arith.constant 0 : index
    %296 = vector.load %arg1[%c37, %c0_223, %c0_224] : memref<50x16x20xf32, #tpu.memory_space<vmem>>, vector<1x16x20xf32>
    %297 = vector.shape_cast %296 : vector<1x16x20xf32> to vector<16x20xf32>
    %cst_225 = arith.constant dense<0.000000e+00> : vector<16x128xf32>
    %298 = tpu.matmul %297, %0, %cst_225 {dimension_numbers = #tpu.dot_dimension_numbers<[1], [0], [0], [1], [0, 0, 1, 1], [], []>} : vector<16x20xf32>, vector<20x128xf32>, vector<16x128xf32> -> vector<16x128xf32>
    %c37_226 = arith.constant 37 : index
    %c0_227 = arith.constant 0 : index
    %c0_228 = arith.constant 0 : index
    %299 = vector.load %arg2[%c37_226, %c0_227, %c0_228] : memref<50x1x128xf32, #tpu.memory_space<vmem>>, vector<1x1x128xf32>
    %300 = vector.shape_cast %299 : vector<1x1x128xf32> to vector<1x128xf32>
    %301 = vector.broadcast %300 : vector<1x128xf32> to vector<16x128xf32>
    %302 = arith.addf %298, %301 : vector<16x128xf32>
    %303 = arith.maximumf %295, %302 : vector<16x128xf32>
    %c38 = arith.constant 38 : index
    %c0_229 = arith.constant 0 : index
    %c0_230 = arith.constant 0 : index
    %304 = vector.load %arg1[%c38, %c0_229, %c0_230] : memref<50x16x20xf32, #tpu.memory_space<vmem>>, vector<1x16x20xf32>
    %305 = vector.shape_cast %304 : vector<1x16x20xf32> to vector<16x20xf32>
    %cst_231 = arith.constant dense<0.000000e+00> : vector<16x128xf32>
    %306 = tpu.matmul %305, %0, %cst_231 {dimension_numbers = #tpu.dot_dimension_numbers<[1], [0], [0], [1], [0, 0, 1, 1], [], []>} : vector<16x20xf32>, vector<20x128xf32>, vector<16x128xf32> -> vector<16x128xf32>
    %c38_232 = arith.constant 38 : index
    %c0_233 = arith.constant 0 : index
    %c0_234 = arith.constant 0 : index
    %307 = vector.load %arg2[%c38_232, %c0_233, %c0_234] : memref<50x1x128xf32, #tpu.memory_space<vmem>>, vector<1x1x128xf32>
    %308 = vector.shape_cast %307 : vector<1x1x128xf32> to vector<1x128xf32>
    %309 = vector.broadcast %308 : vector<1x128xf32> to vector<16x128xf32>
    %310 = arith.addf %306, %309 : vector<16x128xf32>
    %311 = arith.maximumf %303, %310 : vector<16x128xf32>
    %c39 = arith.constant 39 : index
    %c0_235 = arith.constant 0 : index
    %c0_236 = arith.constant 0 : index
    %312 = vector.load %arg1[%c39, %c0_235, %c0_236] : memref<50x16x20xf32, #tpu.memory_space<vmem>>, vector<1x16x20xf32>
    %313 = vector.shape_cast %312 : vector<1x16x20xf32> to vector<16x20xf32>
    %cst_237 = arith.constant dense<0.000000e+00> : vector<16x128xf32>
    %314 = tpu.matmul %313, %0, %cst_237 {dimension_numbers = #tpu.dot_dimension_numbers<[1], [0], [0], [1], [0, 0, 1, 1], [], []>} : vector<16x20xf32>, vector<20x128xf32>, vector<16x128xf32> -> vector<16x128xf32>
    %c39_238 = arith.constant 39 : index
    %c0_239 = arith.constant 0 : index
    %c0_240 = arith.constant 0 : index
    %315 = vector.load %arg2[%c39_238, %c0_239, %c0_240] : memref<50x1x128xf32, #tpu.memory_space<vmem>>, vector<1x1x128xf32>
    %316 = vector.shape_cast %315 : vector<1x1x128xf32> to vector<1x128xf32>
    %317 = vector.broadcast %316 : vector<1x128xf32> to vector<16x128xf32>
    %318 = arith.addf %314, %317 : vector<16x128xf32>
    %319 = arith.maximumf %311, %318 : vector<16x128xf32>
    %c40 = arith.constant 40 : index
    %c0_241 = arith.constant 0 : index
    %c0_242 = arith.constant 0 : index
    %320 = vector.load %arg1[%c40, %c0_241, %c0_242] : memref<50x16x20xf32, #tpu.memory_space<vmem>>, vector<1x16x20xf32>
    %321 = vector.shape_cast %320 : vector<1x16x20xf32> to vector<16x20xf32>
    %cst_243 = arith.constant dense<0.000000e+00> : vector<16x128xf32>
    %322 = tpu.matmul %321, %0, %cst_243 {dimension_numbers = #tpu.dot_dimension_numbers<[1], [0], [0], [1], [0, 0, 1, 1], [], []>} : vector<16x20xf32>, vector<20x128xf32>, vector<16x128xf32> -> vector<16x128xf32>
    %c40_244 = arith.constant 40 : index
    %c0_245 = arith.constant 0 : index
    %c0_246 = arith.constant 0 : index
    %323 = vector.load %arg2[%c40_244, %c0_245, %c0_246] : memref<50x1x128xf32, #tpu.memory_space<vmem>>, vector<1x1x128xf32>
    %324 = vector.shape_cast %323 : vector<1x1x128xf32> to vector<1x128xf32>
    %325 = vector.broadcast %324 : vector<1x128xf32> to vector<16x128xf32>
    %326 = arith.addf %322, %325 : vector<16x128xf32>
    %327 = arith.maximumf %319, %326 : vector<16x128xf32>
    %c41 = arith.constant 41 : index
    %c0_247 = arith.constant 0 : index
    %c0_248 = arith.constant 0 : index
    %328 = vector.load %arg1[%c41, %c0_247, %c0_248] : memref<50x16x20xf32, #tpu.memory_space<vmem>>, vector<1x16x20xf32>
    %329 = vector.shape_cast %328 : vector<1x16x20xf32> to vector<16x20xf32>
    %cst_249 = arith.constant dense<0.000000e+00> : vector<16x128xf32>
    %330 = tpu.matmul %329, %0, %cst_249 {dimension_numbers = #tpu.dot_dimension_numbers<[1], [0], [0], [1], [0, 0, 1, 1], [], []>} : vector<16x20xf32>, vector<20x128xf32>, vector<16x128xf32> -> vector<16x128xf32>
    %c41_250 = arith.constant 41 : index
    %c0_251 = arith.constant 0 : index
    %c0_252 = arith.constant 0 : index
    %331 = vector.load %arg2[%c41_250, %c0_251, %c0_252] : memref<50x1x128xf32, #tpu.memory_space<vmem>>, vector<1x1x128xf32>
    %332 = vector.shape_cast %331 : vector<1x1x128xf32> to vector<1x128xf32>
    %333 = vector.broadcast %332 : vector<1x128xf32> to vector<16x128xf32>
    %334 = arith.addf %330, %333 : vector<16x128xf32>
    %335 = arith.maximumf %327, %334 : vector<16x128xf32>
    %c42 = arith.constant 42 : index
    %c0_253 = arith.constant 0 : index
    %c0_254 = arith.constant 0 : index
    %336 = vector.load %arg1[%c42, %c0_253, %c0_254] : memref<50x16x20xf32, #tpu.memory_space<vmem>>, vector<1x16x20xf32>
    %337 = vector.shape_cast %336 : vector<1x16x20xf32> to vector<16x20xf32>
    %cst_255 = arith.constant dense<0.000000e+00> : vector<16x128xf32>
    %338 = tpu.matmul %337, %0, %cst_255 {dimension_numbers = #tpu.dot_dimension_numbers<[1], [0], [0], [1], [0, 0, 1, 1], [], []>} : vector<16x20xf32>, vector<20x128xf32>, vector<16x128xf32> -> vector<16x128xf32>
    %c42_256 = arith.constant 42 : index
    %c0_257 = arith.constant 0 : index
    %c0_258 = arith.constant 0 : index
    %339 = vector.load %arg2[%c42_256, %c0_257, %c0_258] : memref<50x1x128xf32, #tpu.memory_space<vmem>>, vector<1x1x128xf32>
    %340 = vector.shape_cast %339 : vector<1x1x128xf32> to vector<1x128xf32>
    %341 = vector.broadcast %340 : vector<1x128xf32> to vector<16x128xf32>
    %342 = arith.addf %338, %341 : vector<16x128xf32>
    %343 = arith.maximumf %335, %342 : vector<16x128xf32>
    %c43 = arith.constant 43 : index
    %c0_259 = arith.constant 0 : index
    %c0_260 = arith.constant 0 : index
    %344 = vector.load %arg1[%c43, %c0_259, %c0_260] : memref<50x16x20xf32, #tpu.memory_space<vmem>>, vector<1x16x20xf32>
    %345 = vector.shape_cast %344 : vector<1x16x20xf32> to vector<16x20xf32>
    %cst_261 = arith.constant dense<0.000000e+00> : vector<16x128xf32>
    %346 = tpu.matmul %345, %0, %cst_261 {dimension_numbers = #tpu.dot_dimension_numbers<[1], [0], [0], [1], [0, 0, 1, 1], [], []>} : vector<16x20xf32>, vector<20x128xf32>, vector<16x128xf32> -> vector<16x128xf32>
    %c43_262 = arith.constant 43 : index
    %c0_263 = arith.constant 0 : index
    %c0_264 = arith.constant 0 : index
    %347 = vector.load %arg2[%c43_262, %c0_263, %c0_264] : memref<50x1x128xf32, #tpu.memory_space<vmem>>, vector<1x1x128xf32>
    %348 = vector.shape_cast %347 : vector<1x1x128xf32> to vector<1x128xf32>
    %349 = vector.broadcast %348 : vector<1x128xf32> to vector<16x128xf32>
    %350 = arith.addf %346, %349 : vector<16x128xf32>
    %351 = arith.maximumf %343, %350 : vector<16x128xf32>
    %c44 = arith.constant 44 : index
    %c0_265 = arith.constant 0 : index
    %c0_266 = arith.constant 0 : index
    %352 = vector.load %arg1[%c44, %c0_265, %c0_266] : memref<50x16x20xf32, #tpu.memory_space<vmem>>, vector<1x16x20xf32>
    %353 = vector.shape_cast %352 : vector<1x16x20xf32> to vector<16x20xf32>
    %cst_267 = arith.constant dense<0.000000e+00> : vector<16x128xf32>
    %354 = tpu.matmul %353, %0, %cst_267 {dimension_numbers = #tpu.dot_dimension_numbers<[1], [0], [0], [1], [0, 0, 1, 1], [], []>} : vector<16x20xf32>, vector<20x128xf32>, vector<16x128xf32> -> vector<16x128xf32>
    %c44_268 = arith.constant 44 : index
    %c0_269 = arith.constant 0 : index
    %c0_270 = arith.constant 0 : index
    %355 = vector.load %arg2[%c44_268, %c0_269, %c0_270] : memref<50x1x128xf32, #tpu.memory_space<vmem>>, vector<1x1x128xf32>
    %356 = vector.shape_cast %355 : vector<1x1x128xf32> to vector<1x128xf32>
    %357 = vector.broadcast %356 : vector<1x128xf32> to vector<16x128xf32>
    %358 = arith.addf %354, %357 : vector<16x128xf32>
    %359 = arith.maximumf %351, %358 : vector<16x128xf32>
    %c45 = arith.constant 45 : index
    %c0_271 = arith.constant 0 : index
    %c0_272 = arith.constant 0 : index
    %360 = vector.load %arg1[%c45, %c0_271, %c0_272] : memref<50x16x20xf32, #tpu.memory_space<vmem>>, vector<1x16x20xf32>
    %361 = vector.shape_cast %360 : vector<1x16x20xf32> to vector<16x20xf32>
    %cst_273 = arith.constant dense<0.000000e+00> : vector<16x128xf32>
    %362 = tpu.matmul %361, %0, %cst_273 {dimension_numbers = #tpu.dot_dimension_numbers<[1], [0], [0], [1], [0, 0, 1, 1], [], []>} : vector<16x20xf32>, vector<20x128xf32>, vector<16x128xf32> -> vector<16x128xf32>
    %c45_274 = arith.constant 45 : index
    %c0_275 = arith.constant 0 : index
    %c0_276 = arith.constant 0 : index
    %363 = vector.load %arg2[%c45_274, %c0_275, %c0_276] : memref<50x1x128xf32, #tpu.memory_space<vmem>>, vector<1x1x128xf32>
    %364 = vector.shape_cast %363 : vector<1x1x128xf32> to vector<1x128xf32>
    %365 = vector.broadcast %364 : vector<1x128xf32> to vector<16x128xf32>
    %366 = arith.addf %362, %365 : vector<16x128xf32>
    %367 = arith.maximumf %359, %366 : vector<16x128xf32>
    %c46 = arith.constant 46 : index
    %c0_277 = arith.constant 0 : index
    %c0_278 = arith.constant 0 : index
    %368 = vector.load %arg1[%c46, %c0_277, %c0_278] : memref<50x16x20xf32, #tpu.memory_space<vmem>>, vector<1x16x20xf32>
    %369 = vector.shape_cast %368 : vector<1x16x20xf32> to vector<16x20xf32>
    %cst_279 = arith.constant dense<0.000000e+00> : vector<16x128xf32>
    %370 = tpu.matmul %369, %0, %cst_279 {dimension_numbers = #tpu.dot_dimension_numbers<[1], [0], [0], [1], [0, 0, 1, 1], [], []>} : vector<16x20xf32>, vector<20x128xf32>, vector<16x128xf32> -> vector<16x128xf32>
    %c46_280 = arith.constant 46 : index
    %c0_281 = arith.constant 0 : index
    %c0_282 = arith.constant 0 : index
    %371 = vector.load %arg2[%c46_280, %c0_281, %c0_282] : memref<50x1x128xf32, #tpu.memory_space<vmem>>, vector<1x1x128xf32>
    %372 = vector.shape_cast %371 : vector<1x1x128xf32> to vector<1x128xf32>
    %373 = vector.broadcast %372 : vector<1x128xf32> to vector<16x128xf32>
    %374 = arith.addf %370, %373 : vector<16x128xf32>
    %375 = arith.maximumf %367, %374 : vector<16x128xf32>
    %c47 = arith.constant 47 : index
    %c0_283 = arith.constant 0 : index
    %c0_284 = arith.constant 0 : index
    %376 = vector.load %arg1[%c47, %c0_283, %c0_284] : memref<50x16x20xf32, #tpu.memory_space<vmem>>, vector<1x16x20xf32>
    %377 = vector.shape_cast %376 : vector<1x16x20xf32> to vector<16x20xf32>
    %cst_285 = arith.constant dense<0.000000e+00> : vector<16x128xf32>
    %378 = tpu.matmul %377, %0, %cst_285 {dimension_numbers = #tpu.dot_dimension_numbers<[1], [0], [0], [1], [0, 0, 1, 1], [], []>} : vector<16x20xf32>, vector<20x128xf32>, vector<16x128xf32> -> vector<16x128xf32>
    %c47_286 = arith.constant 47 : index
    %c0_287 = arith.constant 0 : index
    %c0_288 = arith.constant 0 : index
    %379 = vector.load %arg2[%c47_286, %c0_287, %c0_288] : memref<50x1x128xf32, #tpu.memory_space<vmem>>, vector<1x1x128xf32>
    %380 = vector.shape_cast %379 : vector<1x1x128xf32> to vector<1x128xf32>
    %381 = vector.broadcast %380 : vector<1x128xf32> to vector<16x128xf32>
    %382 = arith.addf %378, %381 : vector<16x128xf32>
    %383 = arith.maximumf %375, %382 : vector<16x128xf32>
    %c48 = arith.constant 48 : index
    %c0_289 = arith.constant 0 : index
    %c0_290 = arith.constant 0 : index
    %384 = vector.load %arg1[%c48, %c0_289, %c0_290] : memref<50x16x20xf32, #tpu.memory_space<vmem>>, vector<1x16x20xf32>
    %385 = vector.shape_cast %384 : vector<1x16x20xf32> to vector<16x20xf32>
    %cst_291 = arith.constant dense<0.000000e+00> : vector<16x128xf32>
    %386 = tpu.matmul %385, %0, %cst_291 {dimension_numbers = #tpu.dot_dimension_numbers<[1], [0], [0], [1], [0, 0, 1, 1], [], []>} : vector<16x20xf32>, vector<20x128xf32>, vector<16x128xf32> -> vector<16x128xf32>
    %c48_292 = arith.constant 48 : index
    %c0_293 = arith.constant 0 : index
    %c0_294 = arith.constant 0 : index
    %387 = vector.load %arg2[%c48_292, %c0_293, %c0_294] : memref<50x1x128xf32, #tpu.memory_space<vmem>>, vector<1x1x128xf32>
    %388 = vector.shape_cast %387 : vector<1x1x128xf32> to vector<1x128xf32>
    %389 = vector.broadcast %388 : vector<1x128xf32> to vector<16x128xf32>
    %390 = arith.addf %386, %389 : vector<16x128xf32>
    %391 = arith.maximumf %383, %390 : vector<16x128xf32>
    %c49 = arith.constant 49 : index
    %c0_295 = arith.constant 0 : index
    %c0_296 = arith.constant 0 : index
    %392 = vector.load %arg1[%c49, %c0_295, %c0_296] : memref<50x16x20xf32, #tpu.memory_space<vmem>>, vector<1x16x20xf32>
    %393 = vector.shape_cast %392 : vector<1x16x20xf32> to vector<16x20xf32>
    %cst_297 = arith.constant dense<0.000000e+00> : vector<16x128xf32>
    %394 = tpu.matmul %393, %0, %cst_297 {dimension_numbers = #tpu.dot_dimension_numbers<[1], [0], [0], [1], [0, 0, 1, 1], [], []>} : vector<16x20xf32>, vector<20x128xf32>, vector<16x128xf32> -> vector<16x128xf32>
    %c49_298 = arith.constant 49 : index
    %c0_299 = arith.constant 0 : index
    %c0_300 = arith.constant 0 : index
    %395 = vector.load %arg2[%c49_298, %c0_299, %c0_300] : memref<50x1x128xf32, #tpu.memory_space<vmem>>, vector<1x1x128xf32>
    %396 = vector.shape_cast %395 : vector<1x1x128xf32> to vector<1x128xf32>
    %397 = vector.broadcast %396 : vector<1x128xf32> to vector<16x128xf32>
    %398 = arith.addf %394, %397 : vector<16x128xf32>
    %399 = arith.maximumf %391, %398 : vector<16x128xf32>
    %cst_301 = arith.constant 0.000000e+00 : f32
    %400 = vector.broadcast %cst_301 : f32 to vector<16x128xf32>
    %401 = arith.maximumf %399, %400 : vector<16x128xf32>
    %c0_302 = arith.constant 0 : index
    %c0_303 = arith.constant 0 : index
    %402 = vector.load %arg4[%c0_302, %c0_303] : memref<128x128xf32, #tpu.memory_space<vmem>>, vector<128x128xf32>
    %c0_304 = arith.constant 0 : index
    %c0_305 = arith.constant 0 : index
    %403 = vector.load %arg5[%c0_304, %c0_305] : memref<1x128xf32, #tpu.memory_space<vmem>>, vector<1x128xf32>
    %c0_306 = arith.constant 0 : index
    %c0_307 = arith.constant 0 : index
    %404 = vector.load %arg6[%c0_306, %c0_307] : memref<128x128xf32, #tpu.memory_space<vmem>>, vector<128x128xf32>
    %c0_308 = arith.constant 0 : index
    %c0_309 = arith.constant 0 : index
    %405 = vector.load %arg7[%c0_308, %c0_309] : memref<1x128xf32, #tpu.memory_space<vmem>>, vector<1x128xf32>
    %cst_310 = arith.constant dense<0.000000e+00> : vector<16x128xf32>
    %406 = tpu.matmul %401, %402, %cst_310 {dimension_numbers = #tpu.dot_dimension_numbers<[1], [0], [0], [1], [0, 0, 1, 1], [], []>} : vector<16x128xf32>, vector<128x128xf32>, vector<16x128xf32> -> vector<16x128xf32>
    %407 = vector.broadcast %403 : vector<1x128xf32> to vector<16x128xf32>
    %408 = arith.addf %406, %407 : vector<16x128xf32>
    %cst_311 = arith.constant 0.000000e+00 : f32
    %409 = vector.broadcast %cst_311 : f32 to vector<16x128xf32>
    %410 = arith.maximumf %408, %409 : vector<16x128xf32>
    %cst_312 = arith.constant dense<0.000000e+00> : vector<16x128xf32>
    %411 = tpu.matmul %401, %404, %cst_312 {dimension_numbers = #tpu.dot_dimension_numbers<[1], [0], [0], [1], [0, 0, 1, 1], [], []>} : vector<16x128xf32>, vector<128x128xf32>, vector<16x128xf32> -> vector<16x128xf32>
    %412 = vector.broadcast %405 : vector<1x128xf32> to vector<16x128xf32>
    %413 = arith.addf %411, %412 : vector<16x128xf32>
    %414 = arith.negf %413 : vector<16x128xf32>
    %415 = math.exp %414 : vector<16x128xf32>
    %cst_313 = arith.constant 1.000000e+00 : f32
    %416 = vector.broadcast %cst_313 : f32 to vector<16x128xf32>
    %417 = arith.addf %416, %415 : vector<16x128xf32>
    %418 = arith.divf %416, %417 : vector<16x128xf32>
    %419 = arith.mulf %418, %401 : vector<16x128xf32>
    %cst_314 = arith.constant 1.000000e+00 : f32
    %420 = vector.broadcast %cst_314 : f32 to vector<16x128xf32>
    %421 = arith.subf %420, %418 : vector<16x128xf32>
    %422 = arith.mulf %421, %410 : vector<16x128xf32>
    %423 = arith.addf %419, %422 : vector<16x128xf32>
    %c0_315 = arith.constant 0 : index
    %c0_316 = arith.constant 0 : index
    %424 = vector.load %arg8[%c0_315, %c0_316] : memref<128x128xf32, #tpu.memory_space<vmem>>, vector<128x128xf32>
    %c0_317 = arith.constant 0 : index
    %c0_318 = arith.constant 0 : index
    %425 = vector.load %arg9[%c0_317, %c0_318] : memref<1x128xf32, #tpu.memory_space<vmem>>, vector<1x128xf32>
    %c0_319 = arith.constant 0 : index
    %c0_320 = arith.constant 0 : index
    %426 = vector.load %arg10[%c0_319, %c0_320] : memref<128x128xf32, #tpu.memory_space<vmem>>, vector<128x128xf32>
    %c0_321 = arith.constant 0 : index
    %c0_322 = arith.constant 0 : index
    %427 = vector.load %arg11[%c0_321, %c0_322] : memref<1x128xf32, #tpu.memory_space<vmem>>, vector<1x128xf32>
    %cst_323 = arith.constant dense<0.000000e+00> : vector<16x128xf32>
    %428 = tpu.matmul %423, %424, %cst_323 {dimension_numbers = #tpu.dot_dimension_numbers<[1], [0], [0], [1], [0, 0, 1, 1], [], []>} : vector<16x128xf32>, vector<128x128xf32>, vector<16x128xf32> -> vector<16x128xf32>
    %429 = vector.broadcast %425 : vector<1x128xf32> to vector<16x128xf32>
    %430 = arith.addf %428, %429 : vector<16x128xf32>
    %cst_324 = arith.constant 0.000000e+00 : f32
    %431 = vector.broadcast %cst_324 : f32 to vector<16x128xf32>
    %432 = arith.maximumf %430, %431 : vector<16x128xf32>
    %cst_325 = arith.constant dense<0.000000e+00> : vector<16x128xf32>
    %433 = tpu.matmul %423, %426, %cst_325 {dimension_numbers = #tpu.dot_dimension_numbers<[1], [0], [0], [1], [0, 0, 1, 1], [], []>} : vector<16x128xf32>, vector<128x128xf32>, vector<16x128xf32> -> vector<16x128xf32>
    %434 = vector.broadcast %427 : vector<1x128xf32> to vector<16x128xf32>
    %435 = arith.addf %433, %434 : vector<16x128xf32>
    %436 = arith.negf %435 : vector<16x128xf32>
    %437 = math.exp %436 : vector<16x128xf32>
    %cst_326 = arith.constant 1.000000e+00 : f32
    %438 = vector.broadcast %cst_326 : f32 to vector<16x128xf32>
    %439 = arith.addf %438, %437 : vector<16x128xf32>
    %440 = arith.divf %438, %439 : vector<16x128xf32>
    %441 = arith.mulf %440, %423 : vector<16x128xf32>
    %cst_327 = arith.constant 1.000000e+00 : f32
    %442 = vector.broadcast %cst_327 : f32 to vector<16x128xf32>
    %443 = arith.subf %442, %440 : vector<16x128xf32>
    %444 = arith.mulf %443, %432 : vector<16x128xf32>
    %445 = arith.addf %441, %444 : vector<16x128xf32>
    %c0_328 = arith.constant 0 : index
    %c0_329 = arith.constant 0 : index
    %446 = vector.load %arg12[%c0_328, %c0_329] : memref<128x128xf32, #tpu.memory_space<vmem>>, vector<128x128xf32>
    %c0_330 = arith.constant 0 : index
    %c0_331 = arith.constant 0 : index
    %447 = vector.load %arg13[%c0_330, %c0_331] : memref<1x128xf32, #tpu.memory_space<vmem>>, vector<1x128xf32>
    %cst_332 = arith.constant dense<0.000000e+00> : vector<16x128xf32>
    %448 = tpu.matmul %445, %446, %cst_332 {dimension_numbers = #tpu.dot_dimension_numbers<[1], [0], [0], [1], [0, 0, 1, 1], [], []>} : vector<16x128xf32>, vector<128x128xf32>, vector<16x128xf32> -> vector<16x128xf32>
    %449 = vector.broadcast %447 : vector<1x128xf32> to vector<16x128xf32>
    %450 = arith.addf %448, %449 : vector<16x128xf32>
    %c0_333 = arith.constant 0 : index
    %c0_334 = arith.constant 0 : index
    %451 = vector.load %arg14[%c0_333, %c0_334] : memref<16x128xf32, #tpu.memory_space<vmem>>, vector<16x128xf32>
    tpu.vector_store %arg14[%c0_333, %c0_334], %450 {strides = array<i32>} : memref<16x128xf32, #tpu.memory_space<vmem>>, vector<16x128xf32>,
    return
  }
  func.func @transform_0(%arg0: i32) -> (i32, i32, i32) {
    %c0_i32 = arith.constant 0 : i32
    %c0_i32_0 = arith.constant 0 : i32
    %c0_i32_1 = arith.constant 0 : i32
    return %c0_i32, %arg0, %c0_i32_0 : i32, i32, i32
  }
  func.func @transform_1(%arg0: i32) -> (i32, i32, i32) {
    %c0_i32 = arith.constant 0 : i32
    %c0_i32_0 = arith.constant 0 : i32
    %c0_i32_1 = arith.constant 0 : i32
    %c0_i32_2 = arith.constant 0 : i32
    return %c0_i32, %c0_i32_0, %c0_i32_1 : i32, i32, i32
  }
  func.func @transform_2(%arg0: i32) -> (i32, i32) {
    %c0_i32 = arith.constant 0 : i32
    %c0_i32_0 = arith.constant 0 : i32
    %c0_i32_1 = arith.constant 0 : i32
    return %c0_i32, %c0_i32_0 : i32, i32
  }
  func.func @transform_3(%arg0: i32) -> (i32, i32) {
    %c0_i32 = arith.constant 0 : i32
    %c0_i32_0 = arith.constant 0 : i32
    %c0_i32_1 = arith.constant 0 : i32
    return %c0_i32, %c0_i32_0 : i32, i32
  }
  func.func @transform_4(%arg0: i32) -> (i32, i32) {
    %c0_i32 = arith.constant 0 : i32
    %c0_i32_0 = arith.constant 0 : i32
    %c0_i32_1 = arith.constant 0 : i32
    return %c0_i32, %c0_i32_0 : i32, i32
  }
  func.func @transform_5(%arg0: i32) -> (i32, i32) {
    %c0_i32 = arith.constant 0 : i32
    %c0_i32_0 = arith.constant 0 : i32
    %c0_i32_1 = arith.constant 0 : i32
    return %c0_i32, %c0_i32_0 : i32, i32
  }
  func.func @transform_6(%arg0: i32) -> (i32, i32) {
    %c0_i32 = arith.constant 0 : i32
    %c0_i32_0 = arith.constant 0 : i32
    %c0_i32_1 = arith.constant 0 : i32
    return %c0_i32, %c0_i32_0 : i32, i32
  }
  func.func @transform_7(%arg0: i32) -> (i32, i32) {
    %c0_i32 = arith.constant 0 : i32
    %c0_i32_0 = arith.constant 0 : i32
    %c0_i32_1 = arith.constant 0 : i32
    return %c0_i32, %c0_i32_0 : i32, i32
  }
  func.func @transform_8(%arg0: i32) -> (i32, i32) {
    %c0_i32 = arith.constant 0 : i32
    %c0_i32_0 = arith.constant 0 : i32
    %c0_i32_1 = arith.constant 0 : i32
    return %c0_i32, %c0_i32_0 : i32, i32
  }
  func.func @transform_9(%arg0: i32) -> (i32, i32) {
    %c0_i32 = arith.constant 0 : i32
    %c0_i32_0 = arith.constant 0 : i32
    %c0_i32_1 = arith.constant 0 : i32
    return %c0_i32, %c0_i32_0 : i32, i32
  }
  func.func @transform_10(%arg0: i32) -> (i32, i32) {
    %c0_i32 = arith.constant 0 : i32
    %c0_i32_0 = arith.constant 0 : i32
    %c0_i32_1 = arith.constant 0 : i32
    return %c0_i32, %c0_i32_0 : i32, i32
  }
  func.func @transform_11(%arg0: i32) -> (i32, i32) {
    %c0_i32 = arith.constant 0 : i32
    %c0_i32_0 = arith.constant 0 : i32
    %c0_i32_1 = arith.constant 0 : i32
    return %c0_i32, %c0_i32_0 : i32, i32
  }
  func.func @transform_12(%arg0: i32) -> (i32, i32) {
    %c0_i32 = arith.constant 0 : i32
    %c0_i32_0 = arith.constant 0 : i32
    %c0_i32_1 = arith.constant 0 : i32
    return %c0_i32, %c0_i32_0 : i32, i32
  }
  func.func @transform_13(%arg0: i32) -> (i32, i32) {
    %c0_i32 = arith.constant 0 : i32
    %c0_i32_0 = arith.constant 0 : i32
    return %arg0, %c0_i32 : i32, i32
  }
}

</mosaic_0001>

<bundles_post_ra>
// kernel: tpu_custom_call.1
= control target key start
LH: loop header
LB: loop body
LE: loop exit
PB: predicated region body
PF: predicated region fallthrough
CT: control target
= control target key end

     0   :  { %vm61_vm0 = vcmask 1043456   ;;  %vm54_vm1 = vcmask 162816   ;;  %s3867_s0 = inlined_call_operand.vmem [shape: f32[50,16,20], index: 0, kind: input, shape index: {}]   ;;  %s3868_s1 = inlined_call_operand.vmem [shape: f32[50,1,128], index: 1, kind: input, shape index: {}]   ;;  %s3869_s2 = inlined_call_operand.vmem [shape: f32[20,128], index: 2, kind: input, shape index: {}]   ;;  %s3870_s3 = inlined_call_operand.vmem [shape: f32[128,128], index: 3, kind: input, shape index: {}]   ;;  %s3871_s4 = inlined_call_operand.vmem [shape: f32[1,128], index: 4, kind: input, shape index: {}]   ;;  %s3872_s5 = inlined_call_operand.vmem [shape: f32[128,128], index: 5, kind: input, shape index: {}]   ;;  %s3873_s6 = inlined_call_operand.vmem [shape: f32[1,128], index: 6, kind: input, shape index: {}]   ;;  %s3874_s7 = inlined_call_operand.vmem [shape: f32[128,128], index: 7, kind: input, shape index: {}]   ;;  %s3875_s8 = inlined_call_operand.vmem [shape: f32[1,128], index: 8, kind: input, shape index: {}]   ;;  %s3876_s9 = inlined_call_operand.vmem [shape: f32[128,128], index: 9, kind: input, shape index: {}]   ;;  %s3877_s10 = inlined_call_operand.vmem [shape: f32[1,128], index: 10, kind: input, shape index: {}]   ;;  %s3878_s11 = inlined_call_operand.vmem [shape: f32[128,128], index: 11, kind: input, shape index: {}]   ;;  %s3879_s12 = inlined_call_operand.vmem [shape: f32[1,128], index: 12, kind: input, shape index: {}]   ;;  %s3880_s13 = inlined_call_operand.hbm [shape: f32[16,128], index: 13, kind: output, shape index: {}]  }
   0x1   :  { %v2809_v0 = vld [vmem:[%s3869_s2 + $0x10] sm:$0xf]  ;;  %v2814_v1 = vld [vmem:[%s3869_s2 + $0x8] sm:$0xff]  ;;  %v2825_v2 = vld [vmem:[%s3869_s2] sm:$0xff] }
   0x2   :  { %2344 = vmatpush.msk.msra.mxu3 %vm61_vm0, %v2809_v0  ;;  %2332 = vmatpush.msk.msra.mxu0 %vm61_vm0, %v2809_v0  ;;  %v2341_v3 = vld [vmem:[%s3867_s0 + $0x20] sm:$0xff]  ;;  %v2335_v5 = vld [vmem:[%s3867_s0 + $0x10] sm:$0xff]  ;;  %v2342_v7 = vld [vmem:[%s3867_s0 + $0x28] sm:$0xff] }
   0x3   :  { %2338 = vmatpush.msk.msra.mxu1 %vm61_vm0, %v2809_v0  ;;  %2368 = vmatpush.msk.msra.mxu2 %vm61_vm0, %v2809_v0  ;;  %v48_v4 = vld [vmem:[%s3867_s0] sm:$0xff]  ;;  %v49_v8 = vld [vmem:[%s3867_s0 + $0x8] sm:$0xff]  ;;  %v2336_v9 = vld [vmem:[%s3867_s0 + $0x18] sm:$0xff] }
   0x4   :  { %155 = vmatpush.msra.mxu3 %v2814_v1  ;;  %79 = vmatpush.msra.mxu0 %v2814_v1  ;;  %v2365_v6 = vld [vmem:[%s3867_s0 + $0x60] sm:$0xff]  ;;  %v2366_v10 = vld [vmem:[%s3867_s0 + $0x68] sm:$0xff]  ;;  %v2347_v11 = vld [vmem:[%s3867_s0 + $0x30] sm:$0xff] }
   0x5   :  { %116 = vmatpush.msra.mxu1 %v2814_v1  ;;  %311 = vmatpush.msra.mxu2 %v2814_v1  ;;  %v2353_v12 = vld [vmem:[%s3867_s0 + $0x40] sm:$0xff]  ;;  %v2359_v13 = vld [vmem:[%s3867_s0 + $0x50] sm:$0xff]  ;;  %v2348_v15 = vld [vmem:[%s3867_s0 + $0x38] sm:$0xff] }
   0x6   :  { %156 = vmatpush.msra.mxu3 %v2825_v2  ;;  %80 = vmatpush.msra.mxu0 %v2825_v2  ;;  %v2389_v14 = vld [vmem:[%s3867_s0 + $0xa0] sm:$0xff] }
   0x7   :  { %2345 = vmatmul.msk.f32.vlgmr.msra.gmra.mxu3 %vm54_vm1, %v2341_v3  ;;  %117 = vmatpush.msra.mxu1 %v2825_v2 }
   0x8   :  { %2350 = vmatpush.msk.msrb.mxu3 %vm61_vm0, %v2809_v0  ;;  %2333 = vmatmul.msk.f32.vlgmr.msra.gmra.mxu0 %vm54_vm1, %v48_v4 }
   0x9   :  { %2339 = vmatmul.msk.f32.vlgmr.msra.gmra.mxu1 %vm54_vm1, %v2335_v5  ;;  %2356 = vmatpush.msk.msrb.mxu0 %vm61_vm0, %v2809_v0 }
   0xa   :  { %194 = vmatpush.msrb.mxu3 %v2814_v1  ;;  %2362 = vmatpush.msk.msrb.mxu1 %vm61_vm0, %v2809_v0 }
   0xb   :  { %233 = vmatpush.msrb.mxu0 %v2814_v1  ;;  %312 = vmatpush.msra.mxu2 %v2825_v2 }
   0xc   :  { %195 = vmatpush.msrb.mxu3 %v2825_v2  ;;  %272 = vmatpush.msrb.mxu1 %v2814_v1 }
   0xd   :  { %234 = vmatpush.msrb.mxu0 %v2825_v2  ;;  %2369 = vmatmul.msk.f32.vlgmr.msra.gmra.mxu2 %vm54_vm1, %v2365_v6 }
   0xe   :  { %2374 = vmatpush.msk.msra.mxu3 %vm61_vm0, %v2809_v0  ;;  %273 = vmatpush.msrb.mxu1 %v2825_v2 }
   0xf   :  { %2346 = vmatmul.msk.f32.gmra.mxu3 %vm54_vm1, %v2342_v7  ;;  %2380 = vmatpush.msk.msra.mxu0 %vm61_vm0, %v2809_v0 }
  0x10   :  { %2334 = vmatmul.msk.f32.gmra.mxu0 %vm54_vm1, %v49_v8  ;;  %350 = vmatpush.msra.mxu3 %v2814_v1 }
  0x11   :  { %2340 = vmatmul.msk.f32.gmra.mxu1 %vm54_vm1, %v2336_v9  ;;  %389 = vmatpush.msra.mxu0 %v2814_v1 }
  0x12   :  { %2386 = vmatpush.msk.msra.mxu1 %vm61_vm0, %v2809_v0  ;;  %351 = vmatpush.msra.mxu3 %v2825_v2 }
  0x13   :  { %2392 = vmatpush.msk.msrb.mxu2 %vm61_vm0, %v2809_v0  ;;  %390 = vmatpush.msra.mxu0 %v2825_v2 }
  0x14   :  { %428 = vmatpush.msra.mxu1 %v2814_v1 }
  0x15   :  { %467 = vmatpush.msrb.mxu2 %v2814_v1 }
  0x16   :  { %2370 = vmatmul.msk.f32.gmra.mxu2 %vm54_vm1, %v2366_v10  ;;  %429 = vmatpush.msra.mxu1 %v2825_v2 }
  0x17   :  { %2351 = vmatmul.msk.f32.vlgmr.msrb.gmra.mxu3 %vm54_vm1, %v2347_v11  ;;  %468 = vmatpush.msrb.mxu2 %v2825_v2 }
  0x18   :  { %2357 = vmatmul.msk.f32.vlgmr.msrb.gmra.mxu0 %vm54_vm1, %v2353_v12  ;;  %2398 = vmatpush.msk.msrb.mxu3 %vm61_vm0, %v2809_v0 }
  0x19   :  { %2363 = vmatmul.msk.f32.vlgmr.msrb.gmra.mxu1 %vm54_vm1, %v2359_v13  ;;  %2404 = vmatpush.msk.msrb.mxu0 %vm61_vm0, %v2809_v0 }
  0x1a   :  { %506 = vmatpush.msrb.mxu3 %v2814_v1  ;;  %2410 = vmatpush.msk.msrb.mxu1 %vm61_vm0, %v2809_v0 }
  0x1b   :  { %545 = vmatpush.msrb.mxu0 %v2814_v1  ;;  %2416 = vmatpush.msk.msra.mxu2 %vm61_vm0, %v2809_v0 }
  0x1c   :  { %507 = vmatpush.msrb.mxu3 %v2825_v2  ;;  %584 = vmatpush.msrb.mxu1 %v2814_v1 }
  0x1d   :  { %18 = vsyncpa [#allocation3], 0  ;;  %v2354_v16 = vld [vmem:[%s3867_s0 + $0x48] sm:$0xff]  ;;  %546 = vmatpush.msrb.mxu0 %v2825_v2  ;;  %623 = vmatpush.msra.mxu2 %v2814_v1  ;;  %v2360_v17 = vld [vmem:[%s3867_s0 + $0x58] sm:$0xff]  ;;  %s2733_s15 = smov [#allocation2]   ;;  %s2734_s17 = smov 128  }
  0x1e   :  { %2393 = vmatmul.msk.f32.vlgmr.msrb.gmra.mxu2 %vm54_vm1, %v2389_v14  ;;  %585 = vmatpush.msrb.mxu1 %v2825_v2  ;;  %v2390_v18 = vld [vmem:[%s3867_s0 + $0xa8] sm:$0xff]  ;;  %v2371_v19 = vld [vmem:[%s3867_s0 + $0x70] sm:$0xff]  ;;  %v2377_v20 = vld [vmem:[%s3867_s0 + $0x80] sm:$0xff]  ;;  %s2735_s2 = smov 8  }
  0x1f   :  { %2352 = vmatmul.msk.f32.gmra.mxu3 %vm54_vm1, %v2348_v15  ;;  %624 = vmatpush.msra.mxu2 %v2825_v2  ;;  %v2383_v21 = vld [vmem:[%s3867_s0 + $0x90] sm:$0xff]  ;;  %v2413_v22 = vld [vmem:[%s3867_s0 + $0xe0] sm:$0xff]  ;;  %v2372_v23 = vld [vmem:[%s3867_s0 + $0x78] sm:$0xff] }
  0x20   :  { %2358 = vmatmul.msk.f32.gmra.mxu0 %vm54_vm1, %v2354_v16  ;;  %v2378_v24 = vld [vmem:[%s3867_s0 + $0x88] sm:$0xff]  ;;  %v2384_v25 = vld [vmem:[%s3867_s0 + $0x98] sm:$0xff]  ;;  %v2395_v27 = vld [vmem:[%s3867_s0 + $0xb0] sm:$0xff] }
  0x21   :  { %2440 = vmatpush.msk.msrb.mxu2 %vm61_vm0, %v2809_v0  ;;  %2364 = vmatmul.msk.f32.gmra.mxu1 %vm54_vm1, %v2360_v17  ;;  %v2414_v26 = vld [vmem:[%s3867_s0 + $0xe8] sm:$0xff]  ;;  %v2401_v28 = vld [vmem:[%s3867_s0 + $0xc0] sm:$0xff]  ;;  %v2407_v29 = vld [vmem:[%s3867_s0 + $0xd0] sm:$0xff] }
  0x22   :  { %v2437_v30 = vld [vmem:[%s3867_s0 + $0x120] sm:$0xff]  ;;  %v2396_v31 = vld [vmem:[%s3867_s0 + $0xb8] sm:$0xff]  ;;  %v2402_v32 = vld [vmem:[%s3867_s0 + $0xc8] sm:$0xff] }
  0x23   :  { %779 = vmatpush.msrb.mxu2 %v2814_v1  ;;  %v2408_v33 = vld [vmem:[%s3867_s0 + $0xd8] sm:$0xff]  ;;  %v2438_v34 = vld [vmem:[%s3867_s0 + $0x128] sm:$0xff]  ;;  %v2419_v35 = vld [vmem:[%s3867_s0 + $0xf0] sm:$0xff] }
  0x24   :  { %v2425_v36 = vld [vmem:[%s3867_s0 + $0x100] sm:$0xff]  ;;  %v2431_v37 = vld [vmem:[%s3867_s0 + $0x110] sm:$0xff]  ;;  %v2420_v39 = vld [vmem:[%s3867_s0 + $0xf8] sm:$0xff] }
  0x25   :  { %780 = vmatpush.msrb.mxu2 %v2825_v2  ;;  %v2461_v38 = vld [vmem:[%s3867_s0 + $0x160] sm:$0xff]  ;;  %v2426_v40 = vld [vmem:[%s3867_s0 + $0x108] sm:$0xff]  ;;  %v2432_v41 = vld [vmem:[%s3867_s0 + $0x118] sm:$0xff] }
  0x26   :  { %2394 = vmatmul.msk.f32.gmra.mxu2 %vm54_vm1, %v2390_v18  ;;  %v2462_v42 = vld [vmem:[%s3867_s0 + $0x168] sm:$0xff]  ;;  %v2443_v43 = vld [vmem:[%s3867_s0 + $0x130] sm:$0xff]  ;;  %v2449_v44 = vld [vmem:[%s3867_s0 + $0x140] sm:$0xff] }
  0x27   :  { %2375 = vmatmul.msk.f32.vlgmr.msra.gmra.mxu3 %vm54_vm1, %v2371_v19  ;;  %v2455_v45 = vld [vmem:[%s3867_s0 + $0x150] sm:$0xff]  ;;  %v2485_v46 = vld [vmem:[%s3867_s0 + $0x1a0] sm:$0xff]  ;;  %v2444_v47 = vld [vmem:[%s3867_s0 + $0x138] sm:$0xff] }
  0x28   :  { %2381 = vmatmul.msk.f32.vlgmr.msra.gmra.mxu0 %vm54_vm1, %v2377_v20  ;;  %2422 = vmatpush.msk.msra.mxu3 %vm61_vm0, %v2809_v0  ;;  %v2450_v48 = vld [vmem:[%s3867_s0 + $0x148] sm:$0xff]  ;;  %v2456_v49 = vld [vmem:[%s3867_s0 + $0x158] sm:$0xff]  ;;  %v2467_v51 = vld [vmem:[%s3867_s0 + $0x170] sm:$0xff] }
  0x29   :  { %2387 = vmatmul.msk.f32.vlgmr.msra.gmra.mxu1 %vm54_vm1, %v2383_v21  ;;  %2428 = vmatpush.msk.msra.mxu0 %vm61_vm0, %v2809_v0  ;;  %v2486_v50 = vld [vmem:[%s3867_s0 + $0x1a8] sm:$0xff]  ;;  %v2473_v52 = vld [vmem:[%s3867_s0 + $0x180] sm:$0xff]  ;;  %v2479_v53 = vld [vmem:[%s3867_s0 + $0x190] sm:$0xff] }
  0x2a   :  { %662 = vmatpush.msra.mxu3 %v2814_v1  ;;  %2434 = vmatpush.msk.msra.mxu1 %vm61_vm0, %v2809_v0  ;;  %v2509_v54 = vld [vmem:[%s3867_s0 + $0x1e0] sm:$0xff]  ;;  %v2468_v55 = vld [vmem:[%s3867_s0 + $0x178] sm:$0xff]  ;;  %v2474_v56 = vld [vmem:[%s3867_s0 + $0x188] sm:$0xff] }
  0x2b   :  { %701 = vmatpush.msra.mxu0 %v2814_v1  ;;  %v2480_v57 = vld [vmem:[%s3867_s0 + $0x198] sm:$0xff]  ;;  %v2510_v58 = vld [vmem:[%s3867_s0 + $0x1e8] sm:$0xff]  ;;  %v2491_v59 = vld [vmem:[%s3867_s0 + $0x1b0] sm:$0xff] }
  0x2c   :  { %663 = vmatpush.msra.mxu3 %v2825_v2  ;;  %740 = vmatpush.msra.mxu1 %v2814_v1  ;;  %v2497_v60 = vld [vmem:[%s3867_s0 + $0x1c0] sm:$0xff]  ;;  %v2503_v61 = vld [vmem:[%s3867_s0 + $0x1d0] sm:$0xff]  ;;  %v2492_v63 = vld [vmem:[%s3867_s0 + $0x1b8] sm:$0xff] }
  0x2d   :  { %702 = vmatpush.msra.mxu0 %v2825_v2  ;;  %v2533_v62 = vld [vmem:[%s3867_s0 + $0x220] sm:$0xff]  ;;  %v2498_v3 = vld [vmem:[%s3867_s0 + $0x1c8] sm:$0xff]  ;;  %v2504_v4 = vld [vmem:[%s3867_s0 + $0x1d8] sm:$0xff] }
  0x2e   :  { %2417 = vmatmul.msk.f32.vlgmr.msra.gmra.mxu2 %vm54_vm1, %v2413_v22  ;;  %741 = vmatpush.msra.mxu1 %v2825_v2  ;;  %v2534_v5 = vld [vmem:[%s3867_s0 + $0x228] sm:$0xff]  ;;  %v2515_v6 = vld [vmem:[%s3867_s0 + $0x1f0] sm:$0xff]  ;;  %v2521_v8 = vld [vmem:[%s3867_s0 + $0x200] sm:$0xff] }
  0x2f   :  { %2376 = vmatmul.msk.f32.gmra.mxu3 %vm54_vm1, %v2372_v23  ;;  %2464 = vmatpush.msk.msra.mxu2 %vm61_vm0, %v2809_v0  ;;  %v2527_v10 = vld [vmem:[%s3867_s0 + $0x210] sm:$0xff]  ;;  %v2557_v12 = vld [vmem:[%s3867_s0 + $0x260] sm:$0xff]  ;;  %v2516_v13 = vld [vmem:[%s3867_s0 + $0x1f8] sm:$0xff] }
  0x30   :  { %2382 = vmatmul.msk.f32.gmra.mxu0 %vm54_vm1, %v2378_v24  ;;  %v2522_v15 = vld [vmem:[%s3867_s0 + $0x208] sm:$0xff]  ;;  %v2528_v17 = vld [vmem:[%s3867_s0 + $0x218] sm:$0xff]  ;;  %v2636_v18 = vld [vmem:[%s3868_s1] ss:$0 sm:$0xff] }
  0x31   :  { %2388 = vmatmul.msk.f32.gmra.mxu1 %vm54_vm1, %v2384_v25  ;;  %935 = vmatpush.msra.mxu2 %v2814_v1  ;;  %v2637_v19 = vld [vmem:[%s3868_s1 + $0x1] ss:$0 sm:$0xff]  ;;  %v2558_v22 = vld [vmem:[%s3867_s0 + $0x268] sm:$0xff]  ;;  %v2539_v23 = vld [vmem:[%s3867_s0 + $0x230] sm:$0xff] }
  0x33   :  { %936 = vmatpush.msra.mxu2 %v2825_v2 }
  0x36   :  { %2418 = vmatmul.msk.f32.gmra.mxu2 %vm54_vm1, %v2414_v26  ;;  %v2638_v26 = vld [vmem:[%s3868_s1 + $0x2] ss:$0 sm:$0xff] }
  0x37   :  { %2399 = vmatmul.msk.f32.vlgmr.msrb.gmra.mxu3 %vm54_vm1, %v2395_v27 }
  0x38   :  { %2405 = vmatmul.msk.f32.vlgmr.msrb.gmra.mxu0 %vm54_vm1, %v2401_v28  ;;  %2446 = vmatpush.msk.msrb.mxu3 %vm61_vm0, %v2809_v0  ;;  %v2545_v28 = vld [vmem:[%s3867_s0 + $0x240] sm:$0xff] }
  0x39   :  { %2411 = vmatmul.msk.f32.vlgmr.msrb.gmra.mxu1 %vm54_vm1, %v2407_v29  ;;  %2452 = vmatpush.msk.msrb.mxu0 %vm61_vm0, %v2809_v0 }
  0x3a   :  { %818 = vmatpush.msrb.mxu3 %v2814_v1  ;;  %2458 = vmatpush.msk.msrb.mxu1 %vm61_vm0, %v2809_v0 }
  0x3b   :  { %857 = vmatpush.msrb.mxu0 %v2814_v1 }
  0x3c   :  { %819 = vmatpush.msrb.mxu3 %v2825_v2  ;;  %896 = vmatpush.msrb.mxu1 %v2814_v1 }
  0x3d   :  { %858 = vmatpush.msrb.mxu0 %v2825_v2 }
  0x3e   :  { %2441 = vmatmul.msk.f32.vlgmr.msrb.gmra.mxu2 %vm54_vm1, %v2437_v30  ;;  %897 = vmatpush.msrb.mxu1 %v2825_v2  ;;  %v2551_v30 = vld [vmem:[%s3867_s0 + $0x250] sm:$0xff] }
  0x3f   :  { %2400 = vmatmul.msk.f32.gmra.mxu3 %vm54_vm1, %v2396_v31  ;;  %2488 = vmatpush.msk.msrb.mxu2 %vm61_vm0, %v2809_v0  ;;  %v2639_v31 = vld [vmem:[%s3868_s1 + $0x3] ss:$0 sm:$0xff] }
  0x40   :  { %2406 = vmatmul.msk.f32.gmra.mxu0 %vm54_vm1, %v2402_v32 }
  0x41   :  { %2412 = vmatmul.msk.f32.gmra.mxu1 %vm54_vm1, %v2408_v33  ;;  %1091 = vmatpush.msrb.mxu2 %v2814_v1 }
  0x43   :  { %1092 = vmatpush.msrb.mxu2 %v2825_v2 }
  0x46   :  { %2442 = vmatmul.msk.f32.gmra.mxu2 %vm54_vm1, %v2438_v34 }
  0x47   :  { %2423 = vmatmul.msk.f32.vlgmr.msra.gmra.mxu3 %vm54_vm1, %v2419_v35 }
  0x48   :  { %2429 = vmatmul.msk.f32.vlgmr.msra.gmra.mxu0 %vm54_vm1, %v2425_v36  ;;  %2470 = vmatpush.msk.msra.mxu3 %vm61_vm0, %v2809_v0 }
  0x49   :  { %2435 = vmatmul.msk.f32.vlgmr.msra.gmra.mxu1 %vm54_vm1, %v2431_v37  ;;  %2476 = vmatpush.msk.msra.mxu0 %vm61_vm0, %v2809_v0  ;;  %v2640_v37 = vld [vmem:[%s3868_s1 + $0x4] ss:$0 sm:$0xff] }
  0x4a   :  { %974 = vmatpush.msra.mxu3 %v2814_v1  ;;  %2482 = vmatpush.msk.msra.mxu1 %vm61_vm0, %v2809_v0 }
  0x4b   :  { %1013 = vmatpush.msra.mxu0 %v2814_v1 }
  0x4c   :  { %975 = vmatpush.msra.mxu3 %v2825_v2  ;;  %1052 = vmatpush.msra.mxu1 %v2814_v1 }
  0x4d   :  { %1014 = vmatpush.msra.mxu0 %v2825_v2 }
  0x4e   :  { %2465 = vmatmul.msk.f32.vlgmr.msra.gmra.mxu2 %vm54_vm1, %v2461_v38  ;;  %1053 = vmatpush.msra.mxu1 %v2825_v2  ;;  %v2581_v38 = vld [vmem:[%s3867_s0 + $0x2a0] sm:$0xff] }
  0x4f   :  { %2424 = vmatmul.msk.f32.gmra.mxu3 %vm54_vm1, %v2420_v39  ;;  %2512 = vmatpush.msk.msra.mxu2 %vm61_vm0, %v2809_v0  ;;  %v2540_v39 = vld [vmem:[%s3867_s0 + $0x238] sm:$0xff] }
  0x50   :  { %2430 = vmatmul.msk.f32.gmra.mxu0 %vm54_vm1, %v2426_v40 }
  0x51   :  { %2436 = vmatmul.msk.f32.gmra.mxu1 %vm54_vm1, %v2432_v41  ;;  %1247 = vmatpush.msra.mxu2 %v2814_v1 }
  0x53   :  { %1248 = vmatpush.msra.mxu2 %v2825_v2 }
  0x56   :  { %2466 = vmatmul.msk.f32.gmra.mxu2 %vm54_vm1, %v2462_v42 }
  0x57   :  { %2447 = vmatmul.msk.f32.vlgmr.msrb.gmra.mxu3 %vm54_vm1, %v2443_v43 }
  0x58   :  { %2453 = vmatmul.msk.f32.vlgmr.msrb.gmra.mxu0 %vm54_vm1, %v2449_v44  ;;  %2494 = vmatpush.msk.msrb.mxu3 %vm61_vm0, %v2809_v0  ;;  %v2546_v44 = vld [vmem:[%s3867_s0 + $0x248] sm:$0xff] }
  0x59   :  { %2459 = vmatmul.msk.f32.vlgmr.msrb.gmra.mxu1 %vm54_vm1, %v2455_v45  ;;  %2500 = vmatpush.msk.msrb.mxu0 %vm61_vm0, %v2809_v0 }
  0x5a   :  { %1130 = vmatpush.msrb.mxu3 %v2814_v1  ;;  %2506 = vmatpush.msk.msrb.mxu1 %vm61_vm0, %v2809_v0 }
  0x5b   :  { %1169 = vmatpush.msrb.mxu0 %v2814_v1 }
  0x5c   :  { %1131 = vmatpush.msrb.mxu3 %v2825_v2  ;;  %1208 = vmatpush.msrb.mxu1 %v2814_v1 }
  0x5d   :  { %1170 = vmatpush.msrb.mxu0 %v2825_v2 }
  0x5e   :  { %2489 = vmatmul.msk.f32.vlgmr.msrb.gmra.mxu2 %vm54_vm1, %v2485_v46  ;;  %1209 = vmatpush.msrb.mxu1 %v2825_v2  ;;  %v2552_v46 = vld [vmem:[%s3867_s0 + $0x258] sm:$0xff] }
  0x5f   :  { %2448 = vmatmul.msk.f32.gmra.mxu3 %vm54_vm1, %v2444_v47  ;;  %2536 = vmatpush.msk.msrb.mxu2 %vm61_vm0, %v2809_v0 }
  0x60   :  { %2454 = vmatmul.msk.f32.gmra.mxu0 %vm54_vm1, %v2450_v48 }
  0x61   :  { %2460 = vmatmul.msk.f32.gmra.mxu1 %vm54_vm1, %v2456_v49  ;;  %1403 = vmatpush.msrb.mxu2 %v2814_v1  ;;  %v2641_v49 = vld [vmem:[%s3868_s1 + $0x5] ss:$0 sm:$0xff] }
  0x63   :  { %1404 = vmatpush.msrb.mxu2 %v2825_v2 }
  0x66   :  { %2490 = vmatmul.msk.f32.gmra.mxu2 %vm54_vm1, %v2486_v50 }
  0x67   :  { %2471 = vmatmul.msk.f32.vlgmr.msra.gmra.mxu3 %vm54_vm1, %v2467_v51 }
  0x68   :  { %2477 = vmatmul.msk.f32.vlgmr.msra.gmra.mxu0 %vm54_vm1, %v2473_v52  ;;  %2518 = vmatpush.msk.msra.mxu3 %vm61_vm0, %v2809_v0 }
  0x69   :  { %2483 = vmatmul.msk.f32.vlgmr.msra.gmra.mxu1 %vm54_vm1, %v2479_v53  ;;  %2524 = vmatpush.msk.msra.mxu0 %vm61_vm0, %v2809_v0 }
  0x6a   :  { %1286 = vmatpush.msra.mxu3 %v2814_v1  ;;  %2530 = vmatpush.msk.msra.mxu1 %vm61_vm0, %v2809_v0 }
  0x6b   :  { %1325 = vmatpush.msra.mxu0 %v2814_v1 }
  0x6c   :  { %1287 = vmatpush.msra.mxu3 %v2825_v2  ;;  %1364 = vmatpush.msra.mxu1 %v2814_v1 }
  0x6d   :  { %1326 = vmatpush.msra.mxu0 %v2825_v2 }
  0x6e   :  { %2513 = vmatmul.msk.f32.vlgmr.msra.gmra.mxu2 %vm54_vm1, %v2509_v54  ;;  %1365 = vmatpush.msra.mxu1 %v2825_v2 }
  0x6f   :  { %2472 = vmatmul.msk.f32.gmra.mxu3 %vm54_vm1, %v2468_v55  ;;  %2560 = vmatpush.msk.msra.mxu2 %vm61_vm0, %v2809_v0 }
  0x70   :  { %2478 = vmatmul.msk.f32.gmra.mxu0 %vm54_vm1, %v2474_v56  ;;  %v2642_v56 = vld [vmem:[%s3868_s1 + $0x6] ss:$0 sm:$0xff] }
  0x71   :  { %2484 = vmatmul.msk.f32.gmra.mxu1 %vm54_vm1, %v2480_v57  ;;  %1559 = vmatpush.msra.mxu2 %v2814_v1 }
  0x73   :  { %1560 = vmatpush.msra.mxu2 %v2825_v2 }
  0x76   :  { %2514 = vmatmul.msk.f32.gmra.mxu2 %vm54_vm1, %v2510_v58  ;;  %v2582_v58 = vld [vmem:[%s3867_s0 + $0x2a8] sm:$0xff] }
  0x77   :  { %2495 = vmatmul.msk.f32.vlgmr.msrb.gmra.mxu3 %vm54_vm1, %v2491_v59  ;;  %v2563_v59 = vld [vmem:[%s3867_s0 + $0x270] sm:$0xff] }
  0x78   :  { %2501 = vmatmul.msk.f32.vlgmr.msrb.gmra.mxu0 %vm54_vm1, %v2497_v60  ;;  %2542 = vmatpush.msk.msrb.mxu3 %vm61_vm0, %v2809_v0 }
  0x79   :  { %2507 = vmatmul.msk.f32.vlgmr.msrb.gmra.mxu1 %vm54_vm1, %v2503_v61  ;;  %2548 = vmatpush.msk.msrb.mxu0 %vm61_vm0, %v2809_v0 }
  0x7a   :  { %1442 = vmatpush.msrb.mxu3 %v2814_v1  ;;  %2554 = vmatpush.msk.msrb.mxu1 %vm61_vm0, %v2809_v0 }
  0x7b   :  { %1481 = vmatpush.msrb.mxu0 %v2814_v1 }
  0x7c   :  { %1443 = vmatpush.msrb.mxu3 %v2825_v2  ;;  %1520 = vmatpush.msrb.mxu1 %v2814_v1 }
  0x7d   :  { %1482 = vmatpush.msrb.mxu0 %v2825_v2 }
  0x7e   :  { %2537 = vmatmul.msk.f32.vlgmr.msrb.gmra.mxu2 %vm54_vm1, %v2533_v62  ;;  %1521 = vmatpush.msrb.mxu1 %v2825_v2  ;;  %v2569_v62 = vld [vmem:[%s3867_s0 + $0x280] sm:$0xff] }
  0x7f   :  { %2496 = vmatmul.msk.f32.gmra.mxu3 %vm54_vm1, %v2492_v63  ;;  %2584 = vmatpush.msk.msrb.mxu2 %vm61_vm0, %v2809_v0 }
  0x80   :  { %2502 = vmatmul.msk.f32.gmra.mxu0 %vm54_vm1, %v2498_v3  ;;  %v2575_v3 = vld [vmem:[%s3867_s0 + $0x290] sm:$0xff] }
  0x81   :  { %2508 = vmatmul.msk.f32.gmra.mxu1 %vm54_vm1, %v2504_v4  ;;  %1715 = vmatpush.msrb.mxu2 %v2814_v1 }
  0x83   :  { %1716 = vmatpush.msrb.mxu2 %v2825_v2 }
  0x85   :  { %v82_v7 = vpop.f32.mrf.mxu0 }
  0x86   :  { %v119_v9 = vpop.f32.mrf.mxu1  ;;  %2538 = vmatmul.msk.f32.gmra.mxu2 %vm54_vm1, %v2534_v5  ;;  %v83_v24 = vadd.f32 %v2636_v18, %v82_v7 }
  0x87   :  { %2519 = vmatmul.msk.f32.vlgmr.msra.gmra.mxu3 %vm54_vm1, %v2515_v6  ;;  %v120_v25 = vadd.f32 %v2637_v19, %v119_v9  ;;  %v2644_v9 = vld [vmem:[%s3868_s1 + $0x8] ss:$0 sm:$0xff] }
  0x88   :  { %2525 = vmatmul.msk.f32.vlgmr.msra.gmra.mxu0 %vm54_vm1, %v2521_v8  ;;  %2566 = vmatpush.msk.msra.mxu3 %vm61_vm0, %v2809_v0  ;;  %v2643_v8 = vld [vmem:[%s3868_s1 + $0x7] ss:$0 sm:$0xff] }
  0x89   :  { %2531 = vmatmul.msk.f32.vlgmr.msra.gmra.mxu1 %vm54_vm1, %v2527_v10  ;;  %2572 = vmatpush.msk.msra.mxu0 %vm61_vm0, %v2809_v0  ;;  %v125_v32 = vmax.f32 %v83_v24, %v120_v25  ;;  %v2645_v10 = vld [vmem:[%s3868_s1 + $0x9] ss:$0 sm:$0xff]  ;;  %v2576_v25 = vld [vmem:[%s3867_s0 + $0x298] sm:$0xff] }
  0x8a   :  { %v158_v11 = vpop.f32.mrf.mxu3  ;;  %1598 = vmatpush.msra.mxu3 %v2814_v1  ;;  %2578 = vmatpush.msk.msra.mxu1 %vm61_vm0, %v2809_v0 }
  0x8b   :  { %1637 = vmatpush.msra.mxu0 %v2814_v1  ;;  %v159_v33 = vadd.f32 %v2638_v26, %v158_v11 }
  0x8c   :  { %1599 = vmatpush.msra.mxu3 %v2825_v2  ;;  %1676 = vmatpush.msra.mxu1 %v2814_v1 }
  0x8d   :  { %v85_v14 = vpop.f32.mrf.mxu0  ;;  %1638 = vmatpush.msra.mxu0 %v2825_v2  ;;  %v164_v40 = vmax.f32 %v125_v32, %v159_v33 }
  0x8e   :  { %v122_v16 = vpop.f32.mrf.mxu1  ;;  %2561 = vmatmul.msk.f32.vlgmr.msra.gmra.mxu2 %vm54_vm1, %v2557_v12  ;;  %1677 = vmatpush.msra.mxu1 %v2825_v2  ;;  %v86_v41 = vadd.f32 %v2636_v18, %v85_v14  ;;  %v2646_v18 = vld [vmem:[%s3868_s1 + $0xa] ss:$0 sm:$0xff] }
  0x8f   :  { %2520 = vmatmul.msk.f32.gmra.mxu3 %vm54_vm1, %v2516_v13  ;;  %2608 = vmatpush.msk.msra.mxu2 %vm61_vm0, %v2809_v0  ;;  %v123_v42 = vadd.f32 %v2637_v19, %v122_v16  ;;  %v2605_v19 = vld [vmem:[%s3867_s0 + $0x2e0] sm:$0xff] }
  0x90   :  { %2526 = vmatmul.msk.f32.gmra.mxu0 %vm54_vm1, %v2522_v15  ;;  %v3285_v20 = vpop.f32.mrf.mxu2 }
  0x91   :  { %2532 = vmatmul.msk.f32.gmra.mxu1 %vm54_vm1, %v2528_v17  ;;  %1871 = vmatpush.msra.mxu2 %v2814_v1  ;;  %v126_v50 = vmax.f32 %v86_v41, %v123_v42  ;;  %v315_v5 = vadd.f32 %v2642_v56, %v3285_v20  ;;  %v2564_v20 = vld [vmem:[%s3867_s0 + $0x278] sm:$0xff]  ;;  %v2599_v42 = vld [vmem:[%s3867_s0 + $0x2d0] sm:$0xff] }
  0x92   :  { %v161_v21 = vpop.f32.mrf.mxu3 }
  0x93   :  { %1872 = vmatpush.msra.mxu2 %v2825_v2  ;;  %v162_v51 = vadd.f32 %v2638_v26, %v161_v21 }
  0x95   :  { %v236_v27 = vpop.f32.mrf.mxu0  ;;  %v165_v60 = vmax.f32 %v126_v50, %v162_v51 }
  0x96   :  { %v275_v29 = vpop.f32.mrf.mxu1  ;;  %2562 = vmatmul.msk.f32.gmra.mxu2 %vm54_vm1, %v2558_v22  ;;  %v237_v48 = vadd.f32 %v2640_v37, %v236_v27 }
  0x97   :  { %2543 = vmatmul.msk.f32.vlgmr.msrb.gmra.mxu3 %vm54_vm1, %v2539_v23  ;;  %v276_v55 = vadd.f32 %v2641_v49, %v275_v29  ;;  %v2570_v23 = vld [vmem:[%s3867_s0 + $0x288] sm:$0xff] }
  0x98   :  { %2549 = vmatmul.msk.f32.vlgmr.msrb.gmra.mxu0 %vm54_vm1, %v2545_v28  ;;  %2590 = vmatpush.msk.msrb.mxu3 %vm61_vm0, %v2809_v0 }
  0x99   :  { %2555 = vmatmul.msk.f32.vlgmr.msrb.gmra.mxu1 %vm54_vm1, %v2551_v30  ;;  %v3313_v34 = vpop.f32.mrf.mxu2  ;;  %2596 = vmatpush.msk.msrb.mxu0 %vm61_vm0, %v2809_v0 }
  0x9a   :  { %v197_v35 = vpop.f32.mrf.mxu3  ;;  %1754 = vmatpush.msrb.mxu3 %v2814_v1  ;;  %2602 = vmatpush.msk.msrb.mxu1 %vm61_vm0, %v2809_v0 }
  0x9b   :  { %v198_v36 = vadd.f32 %v2639_v31, %v197_v35  ;;  %1793 = vmatpush.msrb.mxu0 %v2814_v1 }
  0x9c   :  { %1755 = vmatpush.msrb.mxu3 %v2825_v2  ;;  %1832 = vmatpush.msrb.mxu1 %v2814_v1 }
  0x9d   :  { %v239_v43 = vpop.f32.mrf.mxu0  ;;  %1794 = vmatpush.msrb.mxu0 %v2825_v2  ;;  %v203_v47 = vmax.f32 %v164_v40, %v198_v36  ;;  %v2593_v40 = vld [vmem:[%s3867_s0 + $0x2c0] sm:$0xff] }
  0x9e   :  { %v278_v45 = vpop.f32.mrf.mxu1  ;;  %2585 = vmatmul.msk.f32.vlgmr.msrb.gmra.mxu2 %vm54_vm1, %v2581_v38  ;;  %1833 = vmatpush.msrb.mxu1 %v2825_v2  ;;  %v240_v7 = vadd.f32 %v2640_v37, %v239_v43 }
  0x9f   :  { %2544 = vmatmul.msk.f32.gmra.mxu3 %vm54_vm1, %v2540_v39  ;;  %v242_v54 = vmax.f32 %v203_v47, %v237_v48  ;;  %v279_v12 = vadd.f32 %v2641_v49, %v278_v45  ;;  %v2647_v45 = vld [vmem:[%s3868_s1 + $0xb] ss:$0 sm:$0xff]  ;;  %v2649_v48 = vld [vmem:[%s3868_s1 + $0xd] ss:$0 sm:$0xff] }
  0xa0   :  { %2550 = vmatmul.msk.f32.gmra.mxu0 %vm54_vm1, %v2546_v44 }
  0xa1   :  { %2556 = vmatmul.msk.f32.gmra.mxu1 %vm54_vm1, %v2552_v46  ;;  %v470_v52 = vpop.f32.mrf.mxu2  ;;  %v281_v4 = vmax.f32 %v242_v54, %v276_v55  ;;  %v2648_v46 = vld [vmem:[%s3868_s1 + $0xc] ss:$0 sm:$0xff]  ;;  %v2650_v54 = vld [vmem:[%s3868_s1 + $0xe] ss:$0 sm:$0xff]  ;;  %v2588_v55 = vld [vmem:[%s3867_s0 + $0x2b8] sm:$0xff] }
  0xa2   :  { %v200_v53 = vpop.f32.mrf.mxu3  ;;  %v471_v28 = vadd.f32 %v2646_v18, %v470_v52 }
  0xa3   :  { %v201_v57 = vadd.f32 %v2639_v31, %v200_v53  ;;  %v320_v14 = vmax.f32 %v281_v4, %v315_v5 }
  0xa5   :  { %v392_v61 = vpop.f32.mrf.mxu0  ;;  %v204_v6 = vmax.f32 %v165_v60, %v201_v57 }
  0xa6   :  { %v431_v63 = vpop.f32.mrf.mxu1  ;;  %2586 = vmatmul.msk.f32.gmra.mxu2 %vm54_vm1, %v2582_v58  ;;  %v393_v17 = vadd.f32 %v2644_v9, %v392_v61  ;;  %v2600_v61 = vld [vmem:[%s3867_s0 + $0x2d8] sm:$0xff] }
  0xa7   :  { %2567 = vmatmul.msk.f32.vlgmr.msra.gmra.mxu3 %vm54_vm1, %v2563_v59  ;;  %v243_v15 = vmax.f32 %v204_v6, %v240_v7  ;;  %v432_v21 = vadd.f32 %v2645_v10, %v431_v63  ;;  %v2594_v59 = vld [vmem:[%s3867_s0 + $0x2c8] sm:$0xff] }
  0xa8   :  { %2573 = vmatmul.msk.f32.vlgmr.msra.gmra.mxu0 %vm54_vm1, %v2569_v62  ;;  %2614 = vmatpush.msk.msra.mxu3 %vm61_vm0, %v2809_v0 }
  0xa9   :  { %2579 = vmatmul.msk.f32.vlgmr.msra.gmra.mxu1 %vm54_vm1, %v2575_v3  ;;  %v473_v11 = vpop.f32.mrf.mxu2  ;;  %2620 = vmatpush.msk.msra.mxu0 %vm61_vm0, %v2809_v0  ;;  %v282_v26 = vmax.f32 %v243_v15, %v279_v12  ;;  %v2623_v15 = vld [vmem:[%s3867_s0 + $0x310] sm:$0xff] }
  0xaa   :  { %v353_v13 = vpop.f32.mrf.mxu3  ;;  %1910 = vmatpush.msra.mxu3 %v2814_v1  ;;  %2626 = vmatpush.msk.msra.mxu1 %vm61_vm0, %v2809_v0  ;;  %v474_v44 = vadd.f32 %v2646_v18, %v473_v11  ;;  %v2651_v18 = vld [vmem:[%s3868_s1 + $0xf] ss:$0 sm:$0xff] }
  0xab   :  { %v354_v16 = vadd.f32 %v2643_v8, %v353_v13  ;;  %1949 = vmatpush.msra.mxu0 %v2814_v1  ;;  %v2617_v13 = vld [vmem:[%s3867_s0 + $0x300] sm:$0xff] }
  0xac   :  { %1911 = vmatpush.msra.mxu3 %v2825_v2  ;;  %1988 = vmatpush.msra.mxu1 %v2814_v1  ;;  %v318_v1 = vadd.f32 %v2642_v56, %v3313_v34  ;;  %v2587_v34 = vld [vmem:[%s3867_s0 + $0x2b0] sm:$0xff] }
  0xad   :  { %v359_v0 = vmax.f32 %v320_v14, %v354_v16  ;;  %v395_v22 = vpop.f32.mrf.mxu0  ;;  %1950 = vmatpush.msra.mxu0 %v2825_v2 }
  0xae   :  { %v434_v24 = vpop.f32.mrf.mxu1  ;;  %2609 = vmatmul.msk.f32.vlgmr.msra.gmra.mxu2 %vm54_vm1, %v2605_v19  ;;  %1989 = vmatpush.msra.mxu1 %v2825_v2  ;;  %v321_v32 = vmax.f32 %v282_v26, %v318_v1  ;;  %v396_v36 = vadd.f32 %v2644_v9, %v395_v22  ;;  %v2606_v2 = vld [vmem:[%s3867_s0 + $0x2e8] sm:$0xff]  ;;  %v2611_v9 = vld [vmem:[%s3867_s0 + $0x2f0] sm:$0xff]  ;;  %v2612_v26 = vld [vmem:[%s3867_s0 + $0x2f8] sm:$0xff] }
  0xaf   :  { %v398_v27 = vmax.f32 %v359_v0, %v393_v17  ;;  %2568 = vmatmul.msk.f32.gmra.mxu3 %vm54_vm1, %v2564_v20  ;;  %v435_v38 = vadd.f32 %v2645_v10, %v434_v24  ;;  %v2652_v19 = vld [vmem:[%s3868_s1 + $0x10] ss:$0 sm:$0xff]  ;;  %v2653_v0 = vld [vmem:[%s3868_s1 + $0x11] ss:$0 sm:$0xff] }
  0xb0   :  { %2574 = vmatmul.msk.f32.gmra.mxu0 %vm54_vm1, %v2570_v23 }
  0xb1   :  { %v437_v29 = vmax.f32 %v398_v27, %v432_v21  ;;  %2580 = vmatmul.msk.f32.gmra.mxu1 %vm54_vm1, %v2576_v25  ;;  %v626_v30 = vpop.f32.mrf.mxu2 }
  0xb2   :  { %v356_v31 = vpop.f32.mrf.mxu3  ;;  %v627_v63 = vadd.f32 %v2650_v54, %v626_v30 }
  0xb3   :  { %v476_v33 = vmax.f32 %v437_v29, %v471_v28  ;;  %v357_v35 = vadd.f32 %v2643_v8, %v356_v31  ;;  %v2618_v29 = vld [vmem:[%s3867_s0 + $0x308] sm:$0xff]  ;;  %v2624_v31 = vld [vmem:[%s3867_s0 + $0x318] sm:$0xff]  ;;  %s2318_s0 = sshll.u32 %s2733_s15, 4  ;;  %s2319_s0 = int_to_ptr.vmem [resolvable:$true] %s2318_s0 }
  0xb5   :  { %v360_v37 = vmax.f32 %v321_v32, %v357_v35  ;;  %v548_v39 = vpop.f32.mrf.mxu0 }
  0xb6   :  { %v587_v41 = vpop.f32.mrf.mxu1  ;;  %2610 = vmatmul.msk.f32.gmra.mxu2 %vm54_vm1, %v2606_v2  ;;  %v549_v53 = vadd.f32 %v2648_v46, %v548_v39 }
  0xb7   :  { %v399_v43 = vmax.f32 %v360_v37, %v396_v36  ;;  %2591 = vmatmul.msk.f32.vlgmr.msrb.gmra.mxu3 %vm54_vm1, %v2587_v34  ;;  %v588_v57 = vadd.f32 %v2649_v48, %v587_v41 }
  0xb8   :  { %2597 = vmatmul.msk.f32.vlgmr.msrb.gmra.mxu0 %vm54_vm1, %v2593_v40 }
  0xb9   :  { %v438_v47 = vmax.f32 %v399_v43, %v435_v38  ;;  %2603 = vmatmul.msk.f32.vlgmr.msrb.gmra.mxu1 %vm54_vm1, %v2599_v42  ;;  %v629_v49 = vpop.f32.mrf.mxu2 }
  0xba   :  { %v509_v50 = vpop.f32.mrf.mxu3  ;;  %v630_v17 = vadd.f32 %v2650_v54, %v629_v49 }
  0xbb   :  { %v477_v51 = vmax.f32 %v438_v47, %v474_v44  ;;  %v510_v52 = vadd.f32 %v2647_v45, %v509_v50  ;;  %v2654_v47 = vld [vmem:[%s3868_s1 + $0x12] ss:$0 sm:$0xff]  ;;  %v2655_v50 = vld [vmem:[%s3868_s1 + $0x13] ss:$0 sm:$0xff] }
  0xbd   :  { %v515_v56 = vmax.f32 %v476_v33, %v510_v52  ;;  %v551_v58 = vpop.f32.mrf.mxu0 }
  0xbe   :  { %v590_v60 = vpop.f32.mrf.mxu1  ;;  %v552_v8 = vadd.f32 %v2648_v46, %v551_v58 }
  0xbf   :  { %v554_v62 = vmax.f32 %v515_v56, %v549_v53  ;;  %2592 = vmatmul.msk.f32.gmra.mxu3 %vm54_vm1, %v2588_v55  ;;  %v591_v11 = vadd.f32 %v2649_v48, %v590_v60  ;;  %v2656_v55 = vld [vmem:[%s3868_s1 + $0x14] ss:$0 sm:$0xff] }
  0xc0   :  { %2598 = vmatmul.msk.f32.gmra.mxu0 %vm54_vm1, %v2594_v59 }
  0xc1   :  { %v593_v3 = vmax.f32 %v554_v62, %v588_v57  ;;  %2604 = vmatmul.msk.f32.gmra.mxu1 %vm54_vm1, %v2600_v61  ;;  %v782_v4 = vpop.f32.mrf.mxu2  ;;  %v2657_v61 = vld [vmem:[%s3868_s1 + $0x15] ss:$0 sm:$0xff] }
  0xc2   :  { %v512_v5 = vpop.f32.mrf.mxu3 }
  0xc3   :  { %v632_v6 = vmax.f32 %v593_v3, %v627_v63  ;;  %v513_v7 = vadd.f32 %v2647_v45, %v512_v5 }
  0xc5   :  { %v516_v10 = vmax.f32 %v477_v51, %v513_v7  ;;  %v704_v12 = vpop.f32.mrf.mxu0  ;;  %v783_v51 = vadd.f32 %v2654_v47, %v782_v4 }
  0xc6   :  { %v743_v14 = vpop.f32.mrf.mxu1  ;;  %v705_v25 = vadd.f32 %v2652_v19, %v704_v12 }
  0xc7   :  { %v555_v16 = vmax.f32 %v516_v10, %v552_v8  ;;  %2615 = vmatmul.msk.f32.vlgmr.msra.gmra.mxu3 %vm54_vm1, %v2611_v9  ;;  %v744_v27 = vadd.f32 %v2653_v0, %v743_v14  ;;  %v2659_v9 = vld [vmem:[%s3868_s1 + $0x17] ss:$0 sm:$0xff] }
  0xc8   :  { %2621 = vmatmul.msk.f32.vlgmr.msra.gmra.mxu0 %vm54_vm1, %v2617_v13 }
  0xc9   :  { %v594_v20 = vmax.f32 %v555_v16, %v591_v11  ;;  %2627 = vmatmul.msk.f32.vlgmr.msra.gmra.mxu1 %vm54_vm1, %v2623_v15  ;;  %v785_v21 = vpop.f32.mrf.mxu2 }
  0xca   :  { %v665_v22 = vpop.f32.mrf.mxu3  ;;  %v786_v62 = vadd.f32 %v2654_v47, %v785_v21 }
  0xcb   :  { %v633_v23 = vmax.f32 %v594_v20, %v630_v17  ;;  %v666_v24 = vadd.f32 %v2651_v18, %v665_v22  ;;  %v2660_v17 = vld [vmem:[%s3868_s1 + $0x18] ss:$0 sm:$0xff] }
  0xcd   :  { %v671_v1 = vmax.f32 %v632_v6, %v666_v24  ;;  %v707_v28 = vpop.f32.mrf.mxu0  ;;  %v2658_v6 = vld [vmem:[%s3868_s1 + $0x16] ss:$0 sm:$0xff]  ;;  %v2661_v24 = vld [vmem:[%s3868_s1 + $0x19] ss:$0 sm:$0xff] }
  0xce   :  { %v746_v30 = vpop.f32.mrf.mxu1  ;;  %v708_v34 = vadd.f32 %v2652_v19, %v707_v28 }
  0xcf   :  { %v710_v32 = vmax.f32 %v671_v1, %v705_v25  ;;  %2616 = vmatmul.msk.f32.gmra.mxu3 %vm54_vm1, %v2612_v26  ;;  %v747_v38 = vadd.f32 %v2653_v0, %v746_v30  ;;  %v2662_v30 = vld [vmem:[%s3868_s1 + $0x1a] ss:$0 sm:$0xff] }
  0xd0   :  { %2622 = vmatmul.msk.f32.gmra.mxu0 %vm54_vm1, %v2618_v29 }
  0xd1   :  { %v749_v33 = vmax.f32 %v710_v32, %v744_v27  ;;  %2628 = vmatmul.msk.f32.gmra.mxu1 %vm54_vm1, %v2624_v31  ;;  %v938_v35 = vpop.f32.mrf.mxu2 }
  0xd2   :  { %v668_v36 = vpop.f32.mrf.mxu3  ;;  %v939_v13 = vadd.f32 %v2658_v6, %v938_v35 }
  0xd3   :  { %v669_v2 = vadd.f32 %v2651_v18, %v668_v36  ;;  %v788_v56 = vmax.f32 %v749_v33, %v783_v51  ;;  %v2663_v36 = vld [vmem:[%s3868_s1 + $0x1b] ss:$0 sm:$0xff] }
  0xd5   :  { %v672_v37 = vmax.f32 %v633_v23, %v669_v2  ;;  %v860_v39 = vpop.f32.mrf.mxu0 }
  0xd6   :  { %v899_v40 = vpop.f32.mrf.mxu1  ;;  %v861_v60 = vadd.f32 %v2656_v55, %v860_v39 }
  0xd7   :  { %v711_v41 = vmax.f32 %v672_v37, %v708_v34  ;;  %v900_v5 = vadd.f32 %v2657_v61, %v899_v40 }
  0xd9   :  { %v750_v42 = vmax.f32 %v711_v41, %v747_v38  ;;  %v941_v43 = vpop.f32.mrf.mxu2  ;;  %v2664_v41 = vld [vmem:[%s3868_s1 + $0x1c] ss:$0 sm:$0xff] }
  0xda   :  { %v821_v44 = vpop.f32.mrf.mxu3  ;;  %v942_v1 = vadd.f32 %v2658_v6, %v941_v43 }
  0xdb   :  { %v822_v54 = vadd.f32 %v2655_v50, %v821_v44  ;;  %v789_v8 = vmax.f32 %v750_v42, %v786_v62 }
  0xdd   :  { %v863_v45 = vpop.f32.mrf.mxu0  ;;  %v827_v59 = vmax.f32 %v788_v56, %v822_v54  ;;  %v2666_v56 = vld [vmem:[%s3868_s1 + $0x1e] ss:$0 sm:$0xff] }
  0xde   :  { %v902_v46 = vpop.f32.mrf.mxu1  ;;  %v864_v15 = vadd.f32 %v2656_v55, %v863_v45 }
  0xdf   :  { %v866_v4 = vmax.f32 %v827_v59, %v861_v60  ;;  %v903_v21 = vadd.f32 %v2657_v61, %v902_v46  ;;  %v2667_v60 = vld [vmem:[%s3868_s1 + $0x1f] ss:$0 sm:$0xff] }
  0xe1   :  { %v1094_v48 = vpop.f32.mrf.mxu2  ;;  %v905_v12 = vmax.f32 %v866_v4, %v900_v5 }
  0xe2   :  { %v824_v49 = vpop.f32.mrf.mxu3  ;;  %v1095_v34 = vadd.f32 %v2662_v30, %v1094_v48  ;;  %v2665_v48 = vld [vmem:[%s3868_s1 + $0x1d] ss:$0 sm:$0xff] }
  0xe3   :  { %v825_v7 = vadd.f32 %v2655_v50, %v824_v49  ;;  %v944_v20 = vmax.f32 %v905_v12, %v939_v13 }
  0xe5   :  { %v1016_v52 = vpop.f32.mrf.mxu0  ;;  %v828_v14 = vmax.f32 %v789_v8, %v825_v7  ;;  %v2668_v7 = vld [vmem:[%s3868_s1 + $0x20] ss:$0 sm:$0xff] }
  0xe6   :  { %v1055_v53 = vpop.f32.mrf.mxu1  ;;  %v1017_v23 = vadd.f32 %v2660_v17, %v1016_v52 }
  0xe7   :  { %v867_v0 = vmax.f32 %v828_v14, %v864_v15  ;;  %v1056_v29 = vadd.f32 %v2661_v24, %v1055_v53  ;;  %v2669_v15 = vld [vmem:[%s3868_s1 + $0x21] ss:$0 sm:$0xff] }
  0xe9   :  { %v1097_v57 = vpop.f32.mrf.mxu2  ;;  %v906_v26 = vmax.f32 %v867_v0, %v903_v21  ;;  %v2015_v0 = vld [vmem:[%s3870_s3 + $0x70] sm:$0xff] }
  0xea   :  { %v977_v58 = vpop.f32.mrf.mxu3  ;;  %v1098_v52 = vadd.f32 %v2662_v30, %v1097_v57  ;;  %v2032_v21 = vld [vmem:[%s3872_s5 + $0x70] sm:$0xff]  ;;  %v2671_v30 = vld [vmem:[%s3868_s1 + $0x23] ss:$0 sm:$0xff] }
  0xeb   :  { %v978_v16 = vadd.f32 %v2659_v9, %v977_v58  ;;  %v945_v35 = vmax.f32 %v906_v26, %v942_v1  ;;  %v2014_v26 = vld [vmem:[%s3870_s3 + $0x68] sm:$0xff] }
  0xec   :  { %v2031_v1 = vld [vmem:[%s3872_s5 + $0x68] sm:$0xff] }
  0xed   :  { %v1019_v63 = vpop.f32.mrf.mxu0  ;;  %v983_v22 = vmax.f32 %v944_v20, %v978_v16  ;;  %v2016_v16 = vld [vmem:[%s3870_s3 + $0x78] sm:$0xff] }
  0xee   :  { %v1058_v3 = vpop.f32.mrf.mxu1  ;;  %v1020_v38 = vadd.f32 %v2660_v17, %v1019_v63  ;;  %v2033_v17 = vld [vmem:[%s3872_s5 + $0x78] sm:$0xff]  ;;  %2038 = vmatpush.msrb.mxu2 %v2016_v16  ;;  %v2005_v16 = vld [vmem:[%s3870_s3 + $0x20] sm:$0xff] }
  0xef   :  { %v1022_v28 = vmax.f32 %v983_v22, %v1017_v23  ;;  %v1059_v44 = vadd.f32 %v2661_v24, %v1058_v3  ;;  %2066 = vmatpush.msrb.mxu3 %v2033_v17  ;;  %v2670_v24 = vld [vmem:[%s3868_s1 + $0x22] ss:$0 sm:$0xff] }
  0xf0   :  { %2039 = vmatpush.msrb.mxu2 %v2015_v0  ;;  %v2022_v17 = vld [vmem:[%s3872_s5 + $0x20] sm:$0xff]  ;;  %v2004_v0 = vld [vmem:[%s3870_s3 + $0x18] sm:$0xff] }
  0xf1   :  { %v1250_v11 = vpop.f32.mrf.mxu2  ;;  %v1061_v2 = vmax.f32 %v1022_v28, %v1056_v29  ;;  %2067 = vmatpush.msrb.mxu3 %v2032_v21  ;;  %v2021_v21 = vld [vmem:[%s3872_s5 + $0x18] sm:$0xff] }
  0xf2   :  { %v980_v10 = vpop.f32.mrf.mxu3  ;;  %v1251_v3 = vadd.f32 %v2666_v56, %v1250_v11  ;;  %2040 = vmatpush.msrb.mxu2 %v2014_v26 }
  0xf3   :  { %v981_v31 = vadd.f32 %v2659_v9, %v980_v10  ;;  %v1100_v42 = vmax.f32 %v1061_v2, %v1095_v34  ;;  %2068 = vmatpush.msrb.mxu3 %v2031_v1  ;;  %v2003_v1 = vld [vmem:[%s3870_s3 + $0x10] sm:$0xff] }
  0xf5   :  { %v1172_v18 = vpop.f32.mrf.mxu0  ;;  %v984_v37 = vmax.f32 %v945_v35, %v981_v31  ;;  %v2013_v31 = vld [vmem:[%s3870_s3 + $0x60] sm:$0xff] }
  0xf6   :  { %v1211_v19 = vpop.f32.mrf.mxu1  ;;  %v1173_v50 = vadd.f32 %v2664_v41, %v1172_v18  ;;  %2041 = vmatpush.msrb.mxu2 %v2013_v31  ;;  %v2002_v31 = vld [vmem:[%s3870_s3 + $0x8] sm:$0xff] }
  0xf7   :  { %v1023_v43 = vmax.f32 %v984_v37, %v1020_v38  ;;  %v1212_v55 = vadd.f32 %v2665_v48, %v1211_v19  ;;  %v2012_v37 = vld [vmem:[%s3870_s3 + $0x58] sm:$0xff] }
  0xf8   :  { %v2029_v38 = vld [vmem:[%s3872_s5 + $0x58] sm:$0xff]  ;;  %2042 = vmatpush.msrb.mxu2 %v2012_v37 }
  0xf9   :  { %v1253_v27 = vpop.f32.mrf.mxu2  ;;  %v1062_v51 = vmax.f32 %v1023_v43, %v1059_v44  ;;  %v2028_v43 = vld [vmem:[%s3872_s5 + $0x50] sm:$0xff] }
  0xfa   :  { %v1133_v25 = vpop.f32.mrf.mxu3  ;;  %v1254_v20 = vadd.f32 %v2666_v56, %v1253_v27 }
  0xfb   :  { %v1134_v40 = vadd.f32 %v2663_v36, %v1133_v25  ;;  %v1101_v59 = vmax.f32 %v1062_v51, %v1098_v52  ;;  %v2673_v52 = vld [vmem:[%s3868_s1 + $0x25] ss:$0 sm:$0xff] }
  0xfd   :  { %v1175_v32 = vpop.f32.mrf.mxu0  ;;  %v1139_v49 = vmax.f32 %v1100_v42, %v1134_v40  ;;  %v2011_v42 = vld [vmem:[%s3870_s3 + $0x50] sm:$0xff] }
  0xfe   :  { %v1214_v33 = vpop.f32.mrf.mxu1  ;;  %v1176_v5 = vadd.f32 %v2664_v41, %v1175_v32  ;;  %v2030_v32 = vld [vmem:[%s3872_s5 + $0x60] sm:$0xff]  ;;  %2043 = vmatpush.msrb.mxu2 %v2011_v42 }
  0xff   :  { %v1178_v54 = vmax.f32 %v1139_v49, %v1173_v50  ;;  %v1215_v12 = vadd.f32 %v2665_v48, %v1214_v33  ;;  %2069 = vmatpush.msrb.mxu3 %v2030_v32  ;;  %v2672_v41 = vld [vmem:[%s3868_s1 + $0x24] ss:$0 sm:$0xff]  ;;  %v2027_v49 = vld [vmem:[%s3872_s5 + $0x48] sm:$0xff] }
 0x100   :  { %v2019_v32 = vld [vmem:[%s3872_s5 + $0x8] sm:$0xff] }
 0x101   :  { %v1406_v47 = vpop.f32.mrf.mxu2  ;;  %v1217_v63 = vmax.f32 %v1178_v54, %v1212_v55  ;;  %2070 = vmatpush.msrb.mxu3 %v2029_v38  ;;  %v2026_v54 = vld [vmem:[%s3872_s5 + $0x40] sm:$0xff] }
 0x102   :  { %v1136_v39 = vpop.f32.mrf.mxu3  ;;  %v1407_v35 = vadd.f32 %v2670_v24, %v1406_v47  ;;  %v2010_v47 = vld [vmem:[%s3870_s3 + $0x48] sm:$0xff] }
 0x103   :  { %v1137_v58 = vadd.f32 %v2663_v36, %v1136_v39  ;;  %v1256_v9 = vmax.f32 %v1217_v63, %v1251_v3  ;;  %2071 = vmatpush.msrb.mxu3 %v2028_v43  ;;  %2044 = vmatpush.msrb.mxu2 %v2010_v47 }
 0x105   :  { %v1328_v45 = vpop.f32.mrf.mxu0  ;;  %v1140_v4 = vmax.f32 %v1101_v59, %v1137_v58  ;;  %2072 = vmatpush.msrb.mxu3 %v2027_v49 }
 0x106   :  { %v1367_v46 = vpop.f32.mrf.mxu1  ;;  %v1329_v14 = vadd.f32 %v2668_v7, %v1328_v45 }
 0x107   :  { %v1179_v10 = vmax.f32 %v1140_v4, %v1176_v5  ;;  %v1368_v23 = vadd.f32 %v2669_v15, %v1367_v46  ;;  %2073 = vmatpush.msrb.mxu3 %v2026_v54  ;;  %v2674_v4 = vld [vmem:[%s3868_s1 + $0x26] ss:$0 sm:$0xff] }
 0x109   :  { %v3523_v57 = vpop.f32.mrf.mxu2  ;;  %v1218_v19 = vmax.f32 %v1179_v10, %v1215_v12  ;;  %v2023_v10 = vld [vmem:[%s3872_s5 + $0x28] sm:$0xff] }
 0x10a   :  { %v1289_v53 = vpop.f32.mrf.mxu3  ;;  %v1410_v58 = vadd.f32 %v2670_v24, %v3523_v57  ;;  %v2007_v57 = vld [vmem:[%s3870_s3 + $0x30] sm:$0xff] }
 0x10b   :  { %v1290_v6 = vadd.f32 %v2667_v60, %v1289_v53  ;;  %v1257_v29 = vmax.f32 %v1218_v19, %v1254_v20  ;;  %v2009_v53 = vld [vmem:[%s3870_s3 + $0x40] sm:$0xff]  ;;  %v2676_v19 = vld [vmem:[%s3868_s1 + $0x28] ss:$0 sm:$0xff] }
 0x10c   :  { %2045 = vmatpush.msrb.mxu2 %v2009_v53 }
 0x10d   :  { %v1331_v61 = vpop.f32.mrf.mxu0  ;;  %v1295_v13 = vmax.f32 %v1256_v9, %v1290_v6  ;;  %v2024_v6 = vld [vmem:[%s3872_s5 + $0x30] sm:$0xff]  ;;  %v2006_v9 = vld [vmem:[%s3870_s3 + $0x28] sm:$0xff] }
 0x10e   :  { %v1370_v62 = vpop.f32.mrf.mxu1  ;;  %v1332_v2 = vadd.f32 %v2668_v7, %v1331_v61  ;;  %v2025_v61 = vld [vmem:[%s3872_s5 + $0x38] sm:$0xff] }
 0x10f   :  { %v1334_v22 = vmax.f32 %v1295_v13, %v1329_v14  ;;  %v1371_v46 = vadd.f32 %v2669_v15, %v1370_v62  ;;  %2074 = vmatpush.msrb.mxu3 %v2025_v61  ;;  %v2681_v61 = vld [vmem:[%s3868_s1 + $0x2d] ss:$0 sm:$0xff] }
 0x111   :  { %v3554_v28 = vpop.f32.mrf.mxu2  ;;  %v1373_v33 = vmax.f32 %v1334_v22, %v1368_v23  ;;  %2075 = vmatpush.msrb.mxu3 %v2024_v6  ;;  %v2682_v6 = vld [vmem:[%s3868_s1 + $0x2e] ss:$0 sm:$0xff] }
 0x112   :  { %v1292_v8 = vpop.f32.mrf.mxu3  ;;  %v1563_v14 = vadd.f32 %v2674_v4, %v3554_v28 }
 0x113   :  { %v1293_v25 = vadd.f32 %v2667_v60, %v1292_v8  ;;  %v1412_v44 = vmax.f32 %v1373_v33, %v1407_v35  ;;  %v2008_v60 = vld [vmem:[%s3870_s3 + $0x38] sm:$0xff]  ;;  %v2675_v8 = vld [vmem:[%s3868_s1 + $0x27] ss:$0 sm:$0xff]  ;;  %2076 = vmatpush.msrb.mxu3 %v2023_v10 }
 0x114   :  { %2046 = vmatpush.msrb.mxu2 %v2008_v60 }
 0x115   :  { %v1484_v11 = vpop.f32.mrf.mxu0  ;;  %v1296_v36 = vmax.f32 %v1257_v29, %v1293_v25  ;;  %2077 = vmatpush.msrb.mxu3 %v2022_v17  ;;  %v2685_v17 = vld [vmem:[%s3868_s1 + $0x31] ss:$0 sm:$0xff] }
 0x116   :  { %v3537_v18 = vpop.f32.mrf.mxu1  ;;  %v1485_v51 = vadd.f32 %v2672_v41, %v1484_v11  ;;  %2047 = vmatpush.msrb.mxu2 %v2007_v57 }
 0x117   :  { %v1335_v45 = vmax.f32 %v1296_v36, %v1332_v2  ;;  %v1524_v3 = vadd.f32 %v2673_v52, %v3537_v18  ;;  %2078 = vmatpush.msrb.mxu3 %v2021_v21  ;;  %v2001_v2 = vld [vmem:[%s3870_s3] sm:$0xff] }
 0x118   :  { %2048 = vmatpush.msrb.mxu2 %v2006_v9 }
 0x119   :  { %v1565_v55 = vpop.f32.mrf.mxu2  ;;  %v1374_v56 = vmax.f32 %v1335_v45, %v1371_v46 }
 0x11a   :  { %v1445_v27 = vpop.f32.mrf.mxu3  ;;  %2049 = vmatpush.msrb.mxu2 %v2005_v16  ;;  %v1566_v36 = vadd.f32 %v2674_v4, %v1565_v55 }
 0x11b   :  { %v1446_v40 = vadd.f32 %v2671_v30, %v1445_v27  ;;  %v1413_v7 = vmax.f32 %v1374_v56, %v1410_v58  ;;  %v2020_v27 = vld [vmem:[%s3872_s5 + $0x10] sm:$0xff] }
 0x11c   :  { %2050 = vmatpush.msrb.mxu2 %v2004_v0  ;;  %2079 = vmatpush.msrb.mxu3 %v2020_v27 }
 0x11d   :  { %v1487_v34 = vpop.f32.mrf.mxu0  ;;  %v1451_v48 = vmax.f32 %v1412_v44, %v1446_v40  ;;  %v2679_v44 = vld [vmem:[%s3868_s1 + $0x2b] ss:$0 sm:$0xff] }
 0x11e   :  { %v3571_v39 = vpop.f32.mrf.mxu1  ;;  %v1488_v11 = vadd.f32 %v2672_v41, %v1487_v34  ;;  %2051 = vmatpush.msrb.mxu2 %v2003_v1  ;;  %2080 = vmatpush.msrb.mxu3 %v2019_v32  ;;  %v2018_v34 = vld [vmem:[%s3872_s5] sm:$0xff]  ;;  %s2320_s5 = sshll.u32 %s3880_s13, 4  ;;  %s2321_s5 = int_to_ptr.hbm [resolvable:$true] %s2320_s5 }
 0x11f   :  { %v1490_v63 = vmax.f32 %v1451_v48, %v1485_v51  ;;  %v1527_v26 = vadd.f32 %v2673_v52, %v3571_v39  ;;  %v2678_v39 = vld [vmem:[%s3868_s1 + $0x2a] ss:$0 sm:$0xff]  ;;  %v2680_v52 = vld [vmem:[%s3868_s1 + $0x2c] ss:$0 sm:$0xff] }
 0x120   :  { %2052 = vmatpush.msrb.mxu2 %v2002_v31  ;;  %2081 = vmatpush.msrb.mxu3 %v2018_v34 }
 0x121   :  { %v1529_v13 = vmax.f32 %v1490_v63, %v1524_v3  ;;  %v1718_v22 = vpop.f32.mrf.mxu2 }
 0x122   :  { %v1448_v50 = vpop.f32.mrf.mxu3  ;;  %2053 = vmatpush.msrb.mxu2 %v2001_v2  ;;  %v1719_v47 = vadd.f32 %v2678_v39, %v1718_v22 }
 0x123   :  { %v1449_v5 = vadd.f32 %v2671_v30, %v1448_v50  ;;  %v1568_v24 = vmax.f32 %v1529_v13, %v1563_v14  ;;  %v2677_v30 = vld [vmem:[%s3868_s1 + $0x29] ss:$0 sm:$0xff] }
 0x125   :  { %v1640_v59 = vpop.f32.mrf.mxu0  ;;  %v1452_v15 = vmax.f32 %v1413_v7, %v1449_v5 }
 0x126   :  { %v1679_v62 = vpop.f32.mrf.mxu1  ;;  %v1641_v29 = vadd.f32 %v2676_v19, %v1640_v59 }
 0x127   :  { %v1491_v25 = vmax.f32 %v1452_v15, %v1488_v11  ;;  %v1680_v38 = vadd.f32 %v2677_v30, %v1679_v62  ;;  %v2683_v15 = vld [vmem:[%s3868_s1 + $0x2f] ss:$0 sm:$0xff]  ;;  %v2684_v11 = vld [vmem:[%s3868_s1 + $0x30] ss:$0 sm:$0xff] }
 0x129   :  { %v1530_v35 = vmax.f32 %v1491_v25, %v1527_v26  ;;  %v1721_v45 = vpop.f32.mrf.mxu2 }
 0x12a   :  { %v1601_v12 = vpop.f32.mrf.mxu3  ;;  %v1722_v63 = vadd.f32 %v2678_v39, %v1721_v45  ;;  %v2165_v45 = vld [vmem:[%s3876_s9 + $0x68] sm:$0xff] }
 0x12b   :  { %v1602_v18 = vadd.f32 %v2675_v8, %v1601_v12  ;;  %v1569_v43 = vmax.f32 %v1530_v35, %v1566_v36 }
 0x12d   :  { %v1643_v20 = vpop.f32.mrf.mxu0  ;;  %v1607_v28 = vmax.f32 %v1568_v24, %v1602_v18 }
 0x12e   :  { %v1682_v23 = vpop.f32.mrf.mxu1  ;;  %v1644_v50 = vadd.f32 %v2676_v19, %v1643_v20 }
 0x12f   :  { %v1646_v37 = vmax.f32 %v1607_v28, %v1641_v29  ;;  %v1683_v55 = vadd.f32 %v2677_v30, %v1682_v23 }
 0x131   :  { %v1685_v46 = vmax.f32 %v1646_v37, %v1680_v38  ;;  %v1874_v3 = vpop.f32.mrf.mxu2 }
 0x132   :  { %v1604_v33 = vpop.f32.mrf.mxu3  ;;  %v1875_v12 = vadd.f32 %v2682_v6, %v1874_v3  ;;  %v2156_v3 = vld [vmem:[%s3876_s9 + $0x20] sm:$0xff] }
 0x133   :  { %v1605_v40 = vadd.f32 %v2675_v8, %v1604_v33  ;;  %v1724_v53 = vmax.f32 %v1685_v46, %v1719_v47  ;;  %v2147_v46 = vld [vmem:[%s3874_s7 + $0x60] sm:$0xff] }
 0x134   :  { %v2164_v47 = vld [vmem:[%s3876_s9 + $0x60] sm:$0xff] }
 0x135   :  { %v1796_v41 = vpop.f32.mrf.mxu0  ;;  %v1608_v49 = vmax.f32 %v1569_v43, %v1605_v40  ;;  %v2150_v40 = vld [vmem:[%s3874_s7 + $0x78] sm:$0xff]  ;;  %v2166_v43 = vld [vmem:[%s3876_s9 + $0x70] sm:$0xff] }
 0x136   :  { %v1835_v42 = vpop.f32.mrf.mxu1  ;;  %v1797_v60 = vadd.f32 %v2680_v52, %v1796_v41  ;;  %v2167_v41 = vld [vmem:[%s3876_s9 + $0x78] sm:$0xff]  ;;  %2172 = vmatpush.msrb.mxu0 %v2150_v40 }
 0x137   :  { %v1647_v54 = vmax.f32 %v1608_v49, %v1644_v50  ;;  %v1836_v57 = vadd.f32 %v2681_v61, %v1835_v42  ;;  %2200 = vmatpush.msrb.mxu1 %v2167_v41  ;;  %v2149_v42 = vld [vmem:[%s3874_s7 + $0x70] sm:$0xff]  ;;  %v2146_v49 = vld [vmem:[%s3874_s7 + $0x58] sm:$0xff] }
 0x138   :  { %2173 = vmatpush.msrb.mxu0 %v2149_v42  ;;  %v2163_v50 = vld [vmem:[%s3876_s9 + $0x58] sm:$0xff] }
 0x139   :  { %v1686_v62 = vmax.f32 %v1647_v54, %v1683_v55  ;;  %v1877_v23 = vpop.f32.mrf.mxu2  ;;  %2201 = vmatpush.msrb.mxu1 %v2166_v43  ;;  %v2143_v54 = vld [vmem:[%s3874_s7 + $0x40] sm:$0xff] }
 0x13a   :  { %v1757_v48 = vpop.f32.mrf.mxu3  ;;  %v1878_v1 = vadd.f32 %v2682_v6, %v1877_v23  ;;  %v2160_v55 = vld [vmem:[%s3876_s9 + $0x40] sm:$0xff]  ;;  %v2137_v6 = vld [vmem:[%s3874_s7 + $0x10] sm:$0xff] }
 0x13b   :  { %v1758_v51 = vadd.f32 %v2679_v44, %v1757_v48  ;;  %v1725_v8 = vmax.f32 %v1686_v62, %v1722_v63  ;;  %2202 = vmatpush.msrb.mxu1 %v2165_v45  ;;  %v2145_v48 = vld [vmem:[%s3874_s7 + $0x50] sm:$0xff]  ;;  %v2157_v62 = vld [vmem:[%s3876_s9 + $0x28] sm:$0xff]  ;;  %v2139_v63 = vld [vmem:[%s3874_s7 + $0x20] sm:$0xff] }
 0x13d   :  { %v1799_v56 = vpop.f32.mrf.mxu0  ;;  %v1763_v59 = vmax.f32 %v1724_v53, %v1758_v51  ;;  %2203 = vmatpush.msrb.mxu1 %v2164_v47  ;;  %v2162_v51 = vld [vmem:[%s3876_s9 + $0x50] sm:$0xff]  ;;  %v2161_v53 = vld [vmem:[%s3876_s9 + $0x48] sm:$0xff] }
 0x13e   :  { %v1838_v58 = vpop.f32.mrf.mxu1  ;;  %v1800_v14 = vadd.f32 %v2680_v52, %v1799_v56  ;;  %v2144_v52 = vld [vmem:[%s3874_s7 + $0x48] sm:$0xff]  ;;  %v2142_v56 = vld [vmem:[%s3874_s7 + $0x38] sm:$0xff] }
 0x13f   :  { %v1802_v5 = vmax.f32 %v1763_v59, %v1797_v60  ;;  %v1839_v18 = vadd.f32 %v2681_v61, %v1838_v58  ;;  %2204 = vmatpush.msrb.mxu1 %v2163_v50  ;;  %v2159_v58 = vld [vmem:[%s3876_s9 + $0x38] sm:$0xff]  ;;  %v2141_v59 = vld [vmem:[%s3874_s7 + $0x30] sm:$0xff]  ;;  %v2140_v61 = vld [vmem:[%s3874_s7 + $0x28] sm:$0xff] }
 0x140   :  { %v2158_v60 = vld [vmem:[%s3876_s9 + $0x30] sm:$0xff] }
 0x141   :  { %v1841_v10 = vmax.f32 %v1802_v5, %v1836_v57  ;;  %2205 = vmatpush.msrb.mxu1 %v2162_v51  ;;  %v2138_v5 = vld [vmem:[%s3874_s7 + $0x18] sm:$0xff] }
 0x142   :  { %v1760_v4 = vpop.f32.mrf.mxu3  ;;  %v2155_v57 = vld [vmem:[%s3876_s9 + $0x18] sm:$0xff] }
 0x143   :  { %v1761_v7 = vadd.f32 %v2679_v44, %v1760_v4  ;;  %v1880_v20 = vmax.f32 %v1841_v10, %v1875_v12  ;;  %v2148_v44 = vld [vmem:[%s3874_s7 + $0x68] sm:$0xff]  ;;  %2206 = vmatpush.msrb.mxu1 %v2161_v53  ;;  %v2687_v4 = vld [vmem:[%s3873_s6] ss:$0 sm:$0xff] }
 0x144   :  { %2174 = vmatpush.msrb.mxu0 %v2148_v44  ;;  %v2153_v10 = vld [vmem:[%s3876_s9 + $0x8] sm:$0xff] }
 0x145   :  { %v1952_v9 = vpop.f32.mrf.mxu0  ;;  %v1764_v13 = vmax.f32 %v1725_v8, %v1761_v7  ;;  %2207 = vmatpush.msrb.mxu1 %v2160_v55  ;;  %v2154_v7 = vld [vmem:[%s3876_s9 + $0x10] sm:$0xff]  ;;  %v2136_v8 = vld [vmem:[%s3874_s7 + $0x8] sm:$0xff]  ;;  %v2284_v55 = vld [vmem:[%s3878_s11 + $0x78] sm:$0xff] }
 0x146   :  { %v1991_v16 = vpop.f32.mrf.mxu1  ;;  %v1953_v22 = vadd.f32 %v2684_v11, %v1952_v9  ;;  %2175 = vmatpush.msrb.mxu0 %v2147_v46  ;;  %2289 = vmatpush.msra.mxu2 %v2284_v55 }
 0x147   :  { %v1803_v0 = vmax.f32 %v1764_v13, %v1800_v14  ;;  %v1992_v25 = vadd.f32 %v2685_v17, %v1991_v16  ;;  %2208 = vmatpush.msrb.mxu1 %v2159_v58  ;;  %v2135_v13 = vld [vmem:[%s3874_s7] sm:$0xff] }
 0x148   :  { %2176 = vmatpush.msrb.mxu0 %v2146_v49  ;;  %v2152_v14 = vld [vmem:[%s3876_s9] sm:$0xff] }
 0x149   :  { %v1842_v26 = vmax.f32 %v1803_v0, %v1839_v18  ;;  %2209 = vmatpush.msrb.mxu1 %v2158_v60  ;;  %v2281_v58 = vld [vmem:[%s3878_s11 + $0x60] sm:$0xff]  ;;  %v2279_v60 = vld [vmem:[%s3878_s11 + $0x50] sm:$0xff] }
 0x14a   :  { %v1913_v19 = vpop.f32.mrf.mxu3  ;;  %2177 = vmatpush.msrb.mxu0 %v2145_v48 }
 0x14b   :  { %v1914_v21 = vadd.f32 %v2683_v15, %v1913_v19  ;;  %v1881_v32 = vmax.f32 %v1842_v26, %v1878_v1  ;;  %2210 = vmatpush.msrb.mxu1 %v2157_v62  ;;  %v2277_v62 = vld [vmem:[%s3878_s11 + $0x40] sm:$0xff] }
 0x14c   :  { %2178 = vmatpush.msrb.mxu0 %v2144_v52 }
 0x14d   :  { %v1919_v24 = vmax.f32 %v1880_v20, %v1914_v21  ;;  %v1955_v28 = vpop.f32.mrf.mxu0  ;;  %2211 = vmatpush.msrb.mxu1 %v2156_v3  ;;  %v2275_v3 = vld [vmem:[%s3878_s11 + $0x30] sm:$0xff] }
 0x14e   :  { %v1994_v31 = vpop.f32.mrf.mxu1  ;;  %v1956_v36 = vadd.f32 %v2684_v11, %v1955_v28  ;;  %2179 = vmatpush.msrb.mxu0 %v2143_v54 }
 0x14f   :  { %v1958_v27 = vmax.f32 %v1919_v24, %v1953_v22  ;;  %v1995_v34 = vadd.f32 %v2685_v17, %v1994_v31  ;;  %2212 = vmatpush.msrb.mxu1 %v2155_v57  ;;  %v2686_v24 = vld [vmem:[%s3871_s4] ss:$0 sm:$0xff] }
 0x150   :  { %2180 = vmatpush.msrb.mxu0 %v2142_v56  ;;  %v2283_v56 = vld [vmem:[%s3878_s11 + $0x70] sm:$0xff]  ;;  %v2689_v57 = vld [vmem:[%s3877_s10] ss:$0 sm:$0xff] }
 0x151   :  { %v1997_v29 = vmax.f32 %v1958_v27, %v1992_v25  ;;  %2213 = vmatpush.msrb.mxu1 %v2154_v7  ;;  %2290 = vmatpush.msra.mxu2 %v2283_v56  ;;  %v2271_v7 = vld [vmem:[%s3878_s11 + $0x10] sm:$0xff] }
 0x152   :  { %v1916_v30 = vpop.f32.mrf.mxu3  ;;  %2181 = vmatpush.msrb.mxu0 %v2141_v59  ;;  %v2280_v59 = vld [vmem:[%s3878_s11 + $0x58] sm:$0xff] }
 0x153   :  { %v3685_v33 = vmax.f32 %v1997_v29, 0.0  ;;  %v1917_v35 = vadd.f32 %v2683_v15, %v1916_v30  ;;  %2214 = vmatpush.msrb.mxu1 %v2153_v10 }
 0x154   :  { %2182 = vmatpush.msrb.mxu0 %v2140_v61  ;;  %v2278_v61 = vld [vmem:[%s3878_s11 + $0x48] sm:$0xff] }
 0x155   :  { %v1920_v2 = vmax.f32 %v1881_v32, %v1917_v35  ;;  %2054 = vmatmul.f32.vlgmr.msrb.gmra.mxu2 %v3685_v33  ;;  %2082 = vmatmul.f32.vlgmr.msrb.gmra.mxu3 %v3685_v33 }
 0x156   :  { %2183 = vmatpush.msrb.mxu0 %v2139_v63  ;;  %2215 = vmatpush.msrb.mxu1 %v2152_v14  ;;  %v2276_v63 = vld [vmem:[%s3878_s11 + $0x38] sm:$0xff] }
 0x157   :  { %v1959_v37 = vmax.f32 %v1920_v2, %v1956_v36 }
 0x158   :  { %2184 = vmatpush.msrb.mxu0 %v2138_v5  ;;  %v2273_v5 = vld [vmem:[%s3878_s11 + $0x20] sm:$0xff] }
 0x159   :  { %v1998_v38 = vmax.f32 %v1959_v37, %v1995_v34 }
 0x15a   :  { %2185 = vmatpush.msrb.mxu0 %v2137_v6  ;;  %v2272_v6 = vld [vmem:[%s3878_s11 + $0x18] sm:$0xff] }
 0x15b   :  { %v3689_v39 = vmax.f32 %v1998_v38, 0.0 }
 0x15c   :  { %2186 = vmatpush.msrb.mxu0 %v2136_v8  ;;  %v2270_v8 = vld [vmem:[%s3878_s11 + $0x8] sm:$0xff] }
 0x15d   :  { %2057 = vmatmul.f32.gmra.mxu2 %v3689_v39  ;;  %2085 = vmatmul.f32.gmra.mxu3 %v3689_v39 }
 0x15e   :  { %2187 = vmatpush.msrb.mxu0 %v2135_v13 }
 0x1d8   :  { %v2083_v9 = vpop.f32.mrf.mxu3  ;;  %v2055_v23 = vpop.f32.mrf.mxu2 }
 0x1d9   :  { %v2084_v12 = vadd.f32 %v2687_v4, %v2083_v9  ;;  %v2056_v28 = vadd.f32 %v2686_v24, %v2055_v23 }
 0x1db   :  { %v2629_v15 = vmul.f32 -1.442695, %v2084_v12  ;;  %v2061_v2 = vmax.f32 %v2056_v28, 0.0  ;;  %v2269_v12 = vld [vmem:[%s3878_s11] sm:$0xff] }
 0x1dd   :  { %2691 = vpow2.f32 %v2629_v15 }
 0x1e0   :  { %v2086_v11 = vpop.f32.mrf.mxu3  ;;  %v2058_v38 = vpop.f32.mrf.mxu2 }
 0x1e1   :  { %v2087_v16 = vadd.f32 %v2687_v4, %v2086_v11  ;;  %v2059_v45 = vadd.f32 %v2686_v24, %v2058_v38  ;;  %v2274_v4 = vld [vmem:[%s3878_s11 + $0x28] sm:$0xff] }
 0x1e3   :  { %v2692_v17 = vpop.eup %2691  ;;  %v2630_v18 = vmul.f32 -1.442695, %v2087_v16  ;;  %v2062_v51 = vmax.f32 %v2059_v45, 0.0 }
 0x1e4   :  { %v2095_v19 = vadd.f32 1.0, %v2692_v17 }
 0x1e5   :  { %2693 = vpow2.f32 %v2630_v18 }
 0x1e6   :  { %2695 = vrcp.f32 %v2095_v19  ;;  %v2108_v26 = vand.u32 2147483648, %v2095_v19  ;;  %v2106_v27 = vand.u32 2147483647, %v2095_v19  ;;  %vm2102_vm3 = vweird.f32 %v2095_v19 }
 0x1e8   :  { %v2109_v31 = vor.u32 1.1754944e-38, %v2108_v26  ;;  %vm2107_vm5 = vcmp.eq.f32.partialorder %v2106_v27, 8.507059e+37 }
 0x1eb   :  { %v2694_v20 = vpop.eup %2693 }
 0x1ec   :  { %v2696_v0 = vpop.eup %2695  ;;  %v2096_v21 = vadd.f32 1.0, %v2694_v20 }
 0x1ed   :  { %v2098_v22 = vmul.f32 %v2696_v0, %v2095_v19  ;;  %vm2103_vm2 = vweird.f32 %v2696_v0 }
 0x1ee   :  { %2697 = vrcp.f32 %v2096_v21  ;;  %vm2104_vm4 = vmor %vm2102_vm3, %vm2103_vm2  ;;  %v2121_v40 = vand.u32 2147483647, %v2096_v21  ;;  %v2123_v41 = vand.u32 2147483648, %v2096_v21  ;;  %vm2117_vm7 = vweird.f32 %v2096_v21 }
 0x1ef   :  { %v2099_v25 = vsub.f32 1.0, %v2098_v22  ;;  %v2688_v22 = vld [vmem:[%s3875_s8] ss:$0 sm:$0xff] }
 0x1f0   :  { %v2124_v49 = vor.u32 1.1754944e-38, %v2123_v41  ;;  %vm2122_vm9 = vcmp.eq.f32.partialorder %v2121_v40, 8.507059e+37 }
 0x1f1   :  { %v2100_v1 = vmul.f32 %v2696_v0, %v2099_v25 }
 0x1f3   :  { %v2101_v29 = vadd.f32 %v2696_v0, %v2100_v1 }
 0x1f4   :  { %v2698_v30 = vpop.eup %2697 }
 0x1f5   :  { %v2113_v32 = vmul.f32 %v2698_v30, %v2096_v21  ;;  %v2105_v35 = vsel %vm2104_vm4, %v2696_v0, %v2101_v29  ;;  %vm2118_vm6 = vweird.f32 %v2698_v30 }
 0x1f6   :  { %v2110_v36 = vsel %vm2107_vm5, %v2109_v31, %v2105_v35  ;;  %vm2119_vm8 = vmor %vm2117_vm7, %vm2118_vm6 }
 0x1f7   :  { %v2114_v34 = vsub.f32 1.0, %v2113_v32  ;;  %v2129_v37 = vsub.f32 1.0, %v2110_v36  ;;  %v2127_v42 = vmul.f32 %v2110_v36, %v3685_v33 }
 0x1f9   :  { %v2131_v43 = vmul.f32 %v2129_v37, %v2061_v2  ;;  %v2115_v44 = vmul.f32 %v2698_v30, %v2114_v34 }
 0x1fb   :  { %v3796_v46 = vadd.f32 %v2131_v43, %v2127_v42  ;;  %v2116_v47 = vadd.f32 %v2698_v30, %v2115_v44 }
 0x1fd   :  { %2188 = vmatmul.f32.vlgmr.msrb.gmra.mxu0 %v3796_v46  ;;  %2216 = vmatmul.f32.vlgmr.msrb.gmra.mxu1 %v3796_v46  ;;  %v2120_v50 = vsel %vm2119_vm8, %v2698_v30, %v2116_v47 }
 0x1fe   :  { %v2125_v48 = vsel %vm2122_vm9, %v2124_v49, %v2120_v50 }
 0x1ff   :  { %v2130_v52 = vsub.f32 1.0, %v2125_v48  ;;  %v2128_v33 = vmul.f32 %v2125_v48, %v3689_v39  ;;  %v2282_v39 = vld [vmem:[%s3878_s11 + $0x68] sm:$0xff] }
 0x200   :  { %2291 = vmatpush.msra.mxu2 %v2282_v39 }
 0x201   :  { %v2132_v53 = vmul.f32 %v2130_v52, %v2062_v51 }
 0x202   :  { %2292 = vmatpush.msra.mxu2 %v2281_v58 }
 0x203   :  { %v3801_v54 = vadd.f32 %v2132_v53, %v2128_v33 }
 0x204   :  { %2293 = vmatpush.msra.mxu2 %v2280_v59 }
 0x205   :  { %2191 = vmatmul.f32.gmra.mxu0 %v3801_v54  ;;  %2219 = vmatmul.f32.gmra.mxu1 %v3801_v54 }
 0x206   :  { %2294 = vmatpush.msra.mxu2 %v2279_v60 }
 0x208   :  { %2295 = vmatpush.msra.mxu2 %v2278_v61 }
 0x20a   :  { %2296 = vmatpush.msra.mxu2 %v2277_v62 }
 0x20c   :  { %2297 = vmatpush.msra.mxu2 %v2276_v63 }
 0x20e   :  { %2298 = vmatpush.msra.mxu2 %v2275_v3 }
 0x210   :  { %2299 = vmatpush.msra.mxu2 %v2274_v4 }
 0x212   :  { %2300 = vmatpush.msra.mxu2 %v2273_v5 }
 0x214   :  { %2301 = vmatpush.msra.mxu2 %v2272_v6 }
 0x216   :  { %2302 = vmatpush.msra.mxu2 %v2271_v7 }
 0x218   :  { %2303 = vmatpush.msra.mxu2 %v2270_v8 }
 0x21a   :  { %2304 = vmatpush.msra.mxu2 %v2269_v12 }
 0x27a   :  { %v2217_v9 = vpop.f32.mrf.mxu1  ;;  %v2189_v21 = vpop.f32.mrf.mxu0 }
 0x27b   :  { %v2218_v10 = vadd.f32 %v2689_v57, %v2217_v9  ;;  %v2190_v1 = vadd.f32 %v2688_v22, %v2189_v21 }
 0x27d   :  { %v2631_v13 = vmul.f32 -1.442695, %v2218_v10  ;;  %v2195_v35 = vmax.f32 %v2190_v1, 0.0 }
 0x27f   :  { %2699 = vpow2.f32 %v2631_v13 }
 0x282   :  { %v2220_v14 = vpop.f32.mrf.mxu1  ;;  %v2192_v34 = vpop.f32.mrf.mxu0 }
 0x283   :  { %v2221_v15 = vadd.f32 %v2689_v57, %v2220_v14  ;;  %v2193_v43 = vadd.f32 %v2688_v22, %v2192_v34 }
 0x285   :  { %v2700_v11 = vpop.eup %2699  ;;  %v2632_v16 = vmul.f32 -1.442695, %v2221_v15  ;;  %v2196_v48 = vmax.f32 %v2193_v43, 0.0 }
 0x286   :  { %v2229_v17 = vadd.f32 1.0, %v2700_v11 }
 0x287   :  { %2701 = vpow2.f32 %v2632_v16 }
 0x288   :  { %2703 = vrcp.f32 %v2229_v17  ;;  %v2242_v24 = vand.u32 2147483648, %v2229_v17  ;;  %v2240_v26 = vand.u32 2147483647, %v2229_v17  ;;  %vm2236_vm11 = vweird.f32 %v2229_v17 }
 0x28a   :  { %v2243_v29 = vor.u32 1.1754944e-38, %v2242_v24  ;;  %vm2241_vm13 = vcmp.eq.f32.partialorder %v2240_v26, 8.507059e+37 }
 0x28d   :  { %v2702_v18 = vpop.eup %2701 }
 0x28e   :  { %v2704_v19 = vpop.eup %2703  ;;  %v2230_v20 = vadd.f32 1.0, %v2702_v18 }
 0x28f   :  { %v2232_v0 = vmul.f32 %v2704_v19, %v2229_v17  ;;  %vm2237_vm10 = vweird.f32 %v2704_v19 }
 0x290   :  { %2705 = vrcp.f32 %v2230_v20  ;;  %vm2238_vm12 = vmor %vm2236_vm11, %vm2237_vm10  ;;  %v2255_v37 = vand.u32 2147483647, %v2230_v20  ;;  %v2257_v38 = vand.u32 2147483648, %v2230_v20  ;;  %vm2251_vm15 = vweird.f32 %v2230_v20 }
 0x291   :  { %v2233_v23 = vsub.f32 1.0, %v2232_v0 }
 0x292   :  { %v2258_v47 = vor.u32 1.1754944e-38, %v2257_v38  ;;  %vm2256_vm1 = vcmp.eq.f32.partialorder %v2255_v37, 8.507059e+37 }
 0x293   :  { %v2234_v25 = vmul.f32 %v2704_v19, %v2233_v23 }
 0x295   :  { %v2235_v27 = vadd.f32 %v2704_v19, %v2234_v25 }
 0x296   :  { %v2706_v28 = vpop.eup %2705 }
 0x297   :  { %v2247_v30 = vmul.f32 %v2706_v28, %v2230_v20  ;;  %v2239_v31 = vsel %vm2238_vm12, %v2704_v19, %v2235_v27  ;;  %vm2252_vm14 = vweird.f32 %v2706_v28 }
 0x298   :  { %v2244_v32 = vsel %vm2241_vm13, %v2243_v29, %v2239_v31  ;;  %vm2253_vm0 = vmor %vm2251_vm15, %vm2252_vm14 }
 0x299   :  { %v2248_v36 = vsub.f32 1.0, %v2247_v30  ;;  %v2263_v2 = vsub.f32 1.0, %v2244_v32  ;;  %v2261_v40 = vmul.f32 %v2244_v32, %v3796_v46  ;;  %v2690_v46 = vld [vmem:[%s3879_s12] ss:$0 sm:$0xff] }
 0x29b   :  { %v2265_v41 = vmul.f32 %v2263_v2, %v2195_v35  ;;  %v2249_v42 = vmul.f32 %v2706_v28, %v2248_v36 }
 0x29d   :  { %v2267_v44 = vadd.f32 %v2265_v41, %v2261_v40  ;;  %v2250_v45 = vadd.f32 %v2706_v28, %v2249_v42 }
 0x29f   :  { %2305 = vmatmul.f32.vlgmr.msra.gmra.mxu2 %v2267_v44  ;;  %v2254_v49 = vsel %vm2253_vm0, %v2706_v28, %v2250_v45 }
 0x2a0   :  { %v2259_v50 = vsel %vm2256_vm1, %v2258_v47, %v2254_v49 }
 0x2a1   :  { %v2264_v51 = vsub.f32 1.0, %v2259_v50  ;;  %v2262_v52 = vmul.f32 %v2259_v50, %v3801_v54 }
 0x2a3   :  { %v2266_v33 = vmul.f32 %v2264_v51, %v2196_v48 }
 0x2a5   :  { %v2268_v53 = vadd.f32 %v2266_v33, %v2262_v52 }
 0x2a7   :  { %2308 = vmatmul.f32.gmra.mxu2 %v2268_v53 }
 0x322   :  { %v2306_v55 = vpop.f32.mrf.mxu2 }
 0x323   :  { %v2307_v56 = vadd.f32 %v2690_v46, %v2306_v55 }
 0x325   :  { %2312 = vst [vmem:[#allocation2] sm:$0xff] %v2307_v56 }
 0x32a   :  { %v2309_v39 = vpop.f32.mrf.mxu2 }
 0x32b   :  { %v2310_v54 = vadd.f32 %v2690_v46, %v2309_v39 }
 0x32d   :  { %2313 = vst [vmem:[#allocation2 + $0x8] sm:$0xff] %v2310_v54 }
 0x32e   :  { %2326 = dma.vmem_to_hbm [thread:$0]  %s2319_s0, 256, %s2321_s5, [#allocation3], %s2734_s17, %s2734_s17, %s2735_s2  }
 0x32f   :  { %2731 = dma.done.wait [#allocation3], 256  }
 0x330   :  { %2732 = vsyncadd [#allocation3], 4294967040 }
 0x331   :  { %2331 = vsyncpa [#allocation3], 1 }

</bundles_post_ra>
